<compile_context>
chip_gen: v7x
topology: tpu7x:2x2x1
jax: 0.10.0
libtpu: 0.0.40
codegen_flags: <defaults>
</compile_context>

<pallas_src>
import jax
import jax.numpy as jnp
from jax.experimental import pallas as pl
from jax.experimental.pallas import tpu as pltpu

# ----------------------------- configuration (consistent w/ module) ----------
PAD_IDX = 1
VOCAB = 32
K_EMB = 8            # k_emb of DecomposedEmbedding
D = 32               # embedding_dim
FFN = 64             # ffn_embedding_dim
K_FFN = 16           # k_ffn of DecomposedLinear
HEADS = 4
HEAD_DIM = D // HEADS
LAYERS = 2
MAX_SEQ = 16
NPOS = MAX_SEQ + PAD_IDX + 1   # learned PositionalEmbedding table size
NUM_SEG = 2
LN_EPS = 1e-5
OH_W = 64            # fused one-hot width: VOCAB + NPOS + NUM_SEG = 52, padded to 64
LANES = 128
# finite mask instead of -inf: rows whose keys are ALL padding get a uniform
# softmax instead of NaN (documented semantic difference, reviewer-approved).
NEG_INF = -1e30


# ----------------------------- in-kernel helpers ------------------------------
def _layer_norm(x, g, b):
    mu = jnp.mean(x, axis=-1, keepdims=True)
    var = jnp.mean((x - mu) ** 2, axis=-1, keepdims=True)
    return (x - mu) * jax.lax.rsqrt(var + LN_EPS) * g + b


def _lane_pack(x):
    """(BT, D) -> (BT*D/128, 128) lane-dense slab using only sublane-split
    reshape + leading-dim indexing + lane concat (all known-good lowerings).
    Row r holds tokens [r, rows + r, 2*rows + r, ...]; unpacked in the wrapper."""
    bt, d = x.shape
    g = LANES // d                       # token rows packed per 128-lane output row
    x3 = x.reshape(g, bt // g, d)        # sublane-dim split into a leading dim
    return jnp.concatenate([x3[j] for j in range(g)], axis=-1)   # (bt//g, 128)


# ----------------------------- the single fused kernel ------------------------
def _fused_encoder_kernel(oh_ref, bias_ref, table_ref,
                          attw_ref, ffn1_ref, ffn2_ref, vec_d_ref, vec_f_ref,
                          out_ref):
    T = bias_ref.shape[2]
    B = bias_ref.shape[0] // HEADS
    BT = oh_ref.shape[0]

    # ---- fused embedding gather: one MXU matmul replaces emb_l@emb_r compose +
    # token / positional / segment gathers.  Pad-token one-hot rows were zeroed
    # on the host, so padded positions come out as exact zeros (== fairseq's
    # `x *= 1 - padding_mask`).
    # TODO(synk): dynamic index gather has no clean Mosaic lowering at this size;
    # the gather is expressed exactly as a 0/1 one-hot matmul on the MXU.
    x = jnp.dot(oh_ref[...], table_ref[...],
                preferred_element_type=jnp.float32)                       # (BT, D)
    out_ref[0] = _lane_pack(x)           # inner_states[0] (pre-layer embedding)

    bias = bias_ref[...]                 # (H*B, 1, T) additive key-padding bias

    def split_heads(t2):                 # (BT, D) -> (H*B, T, HEAD_DIM), head-major
        t3 = t2.reshape(B, T, D)
        return jnp.concatenate(
            [t3[:, :, h * HEAD_DIM:(h + 1) * HEAD_DIM] for h in range(HEADS)],
            axis=0)

    for i in range(LAYERS):              # static unroll; weights stacked on axis 0
        aw = attw_ref[i]                 # (4, D, D): wq*scale, wk, wv, wo (pre-T)
        vd = vec_d_ref[i]                # (9, D): bq*s, bk, bv, bo, ln1g, ln1b, f2b, ln2g, ln2b
        w1 = ffn1_ref[i]                 # (D, FFN)  composed fc1 weight (pre-T)
        w2 = ffn2_ref[i]                 # (FFN, D)  composed fc2 weight (pre-T)
        f1b = vec_f_ref[i]               # (1, FFN)

        # ---- self-attention (q-scaling pre-folded into aw[0]/vd[0]) ----------
        q = jnp.dot(x, aw[0], preferred_element_type=jnp.float32) + vd[0]
        k = jnp.dot(x, aw[1], preferred_element_type=jnp.float32) + vd[1]
        v = jnp.dot(x, aw[2], preferred_element_type=jnp.float32) + vd[2]

        qh, kh, vh = split_heads(q), split_heads(k), split_heads(v)

        # batched scores + key-padding bias + softmax, ONCE over all heads
        scores = jnp.einsum('btd,bsd->bts', qh, kh,
                            preferred_element_type=jnp.float32) + bias    # (HB,T,T)
        m = jnp.max(scores, axis=-1, keepdims=True)
        e = jnp.exp(scores - m)
        probs = e * pl.reciprocal(jnp.sum(e, axis=-1, keepdims=True), approx=True)
        ctx = jnp.einsum('bts,bsd->btd', probs, vh,
                         preferred_element_type=jnp.float32)              # (HB,T,Hd)

        # merge heads with ONE lane concat, then a single full W_o matmul
        ctx2 = jnp.concatenate(
            [ctx[h * B:(h + 1) * B].reshape(BT, HEAD_DIM) for h in range(HEADS)],
            axis=-1)                                                      # (BT, D)
        attn = jnp.dot(ctx2, aw[3], preferred_element_type=jnp.float32) + vd[3]

        # residual + self_attn_layer_norm (post-LN)
        x = _layer_norm(x + attn, vd[4], vd[5])

        # ---- FFN (low-rank factors pre-composed; one matmul per stage) -------
        h1 = jnp.dot(x, w1, preferred_element_type=jnp.float32) + f1b
        h1 = jnp.maximum(h1, 0.0)        # activation_fn = relu
        h2 = jnp.dot(h1, w2, preferred_element_type=jnp.float32) + vd[6]

        # residual + final_layer_norm (post-LN)
        x = _layer_norm(x + h2, vd[7], vd[8])
        out_ref[i + 1] = _lane_pack(x)


# ----------------------------- parameters ------------------------------------
def init_params(key):
    """Parameters in the original (PyTorch-module) orientation."""
    def nrm(k, shape, scale=0.02):
        return scale * jax.random.normal(k, shape, jnp.float32)

    keys = jax.random.split(key, 4 + LAYERS)
    params = {
        'emb_l': nrm(keys[0], (VOCAB, K_EMB), 1.0),
        'emb_r': nrm(keys[1], (K_EMB, D), 0.05),
        'pos': nrm(keys[2], (NPOS, D)),
        'seg': nrm(keys[3], (NUM_SEG, D)),
        'layers': [],
    }
    for i in range(LAYERS):
        lk = jax.random.split(keys[4 + i], 12)
        params['layers'].append({
            'wq': nrm(lk[0], (D, D)), 'wk': nrm(lk[1], (D, D)), 'wv': nrm(lk[2], (D, D)),
            'bq': nrm(lk[3], (1, D)), 'bk': nrm(lk[4], (1, D)), 'bv': nrm(lk[5], (1, D)),
            'wo': nrm(lk[6], (D, D)), 'bo': nrm(lk[7], (1, D)),
            'ln1_g': jnp.ones((1, D), jnp.float32), 'ln1_b': jnp.zeros((1, D), jnp.float32),
            'fc1_wl': nrm(lk[8], (FFN, K_FFN)), 'fc1_wr': nrm(lk[9], (K_FFN, D)),
            'fc1_b': jnp.zeros((1, FFN), jnp.float32),
            'fc2_wl': nrm(lk[10], (D, K_FFN)), 'fc2_wr': nrm(lk[11], (K_FFN, FFN)),
            'fc2_b': jnp.zeros((1, D), jnp.float32),
            'ln2_g': jnp.ones((1, D), jnp.float32), 'ln2_b': jnp.zeros((1, D), jnp.float32),
        })
    return params


def prepare_kernel_params(params):
    """One-time host prep: pre-compose the low-rank factors (embedding + FFN),
    fold the q scaling into wq/bq, pre-transpose everything into the orientation
    the kernel consumes, and pack the per-layer weights into a few stacked slabs
    so the kernel launch issues ~8 input DMAs instead of 27."""
    scaling = HEAD_DIM ** -0.5
    layers = params['layers']

    # fused gather table: [emb_l @ emb_r ; positional ; segment ; zero pad]
    emb_table = params['emb_l'] @ params['emb_r']                          # (V, D)
    table = jnp.concatenate(
        [emb_table, params['pos'], params['seg'],
         jnp.zeros((OH_W - VOCAB - NPOS - NUM_SEG, D), jnp.float32)], axis=0)  # (OH_W, D)

    def stk(f):
        return jnp.stack([f(lp) for lp in layers], axis=0)

    attw = stk(lambda lp: jnp.stack(
        [lp['wq'].T * scaling, lp['wk'].T, lp['wv'].T, lp['wo'].T], axis=0))    # (L,4,D,D)
    vec_d = stk(lambda lp: jnp.stack(
        [lp['bq'][0] * scaling, lp['bk'][0], lp['bv'][0], lp['bo'][0],
         lp['ln1_g'][0], lp['ln1_b'][0], lp['fc2_b'][0],
         lp['ln2_g'][0], lp['ln2_b'][0]], axis=0))                              # (L,9,D)
    vec_f = stk(lambda lp: lp['fc1_b'])                                         # (L,1,FFN)
    # composed FFN weights (not bit-exact vs. factored form; tolerance-equal)
    ffn1 = stk(lambda lp: (lp['fc1_wl'] @ lp['fc1_wr']).T)                      # (L,D,FFN)
    ffn2 = stk(lambda lp: (lp['fc2_wl'] @ lp['fc2_wr']).T)                      # (L,FFN,D)

    return {'table': table, 'attw': attw, 'ffn1': ffn1, 'ffn2': ffn2,
            'vec_d': vec_d, 'vec_f': vec_f}


# ----------------------------- forward (single Pallas launch) -----------------
@jax.jit
def forward(kp, tokens, segment_labels):
    B, T = tokens.shape
    BT = B * T
    assert LANES % D == 0 and BT % (LANES // D) == 0, "lane-pack needs 128 % D == 0"
    g = LANES // D
    rows = BT // g

    notpad = tokens != PAD_IDX
    keep = notpad.astype(jnp.float32)                                      # (B, T)
    # fairseq make_positions: cumsum of non-pad mask, offset by padding_idx
    positions = (jnp.cumsum(notpad.astype(jnp.int32), axis=1)
                 * notpad.astype(jnp.int32) + PAD_IDX)

    # fused one-hot: [token | position | segment], pad rows zeroed so the gather
    # matmul produces exact zeros at padded positions (replaces keep-mask mult).
    oh = jnp.concatenate(
        [jax.nn.one_hot(tokens, VOCAB, dtype=jnp.float32),
         jax.nn.one_hot(positions, NPOS, dtype=jnp.float32),
         jax.nn.one_hot(segment_labels, NUM_SEG, dtype=jnp.float32)], axis=-1)
    oh = oh * keep[..., None]
    oh = jnp.pad(oh, ((0, 0), (0, 0), (0, OH_W - oh.shape[-1]))).reshape(BT, OH_W)

    # additive key-padding bias, pre-tiled per head (head-major ordering to match
    # the in-kernel leading-axis head concat)
    attn_bias = jnp.tile(((1.0 - keep) * NEG_INF)[:, None, :], (HEADS, 1, 1))  # (H*B,1,T)

    args = (oh, attn_bias, kp['table'], kp['attw'], kp['ffn1'], kp['ffn2'],
            kp['vec_d'], kp['vec_f'])

    # Everything fits in VMEM at these shapes, so a single gridless call keeps the
    # activations resident for the whole forward (no inter-layer HBM traffic).
    # TODO(synk): if B/T/D grow, add a "parallel" batch grid axis (v7x megacore)
    # and tile the token axis with BlockSpecs under the 64 MiB v7x VMEM budget.
    states = pl.pallas_call(
        _fused_encoder_kernel,
        out_shape=jax.ShapeDtypeStruct((LAYERS + 1, rows, LANES), jnp.float32),
        in_specs=[pl.BlockSpec(memory_space=pltpu.MemorySpace.VMEM)] * len(args),
        out_specs=pl.BlockSpec(memory_space=pltpu.MemorySpace.VMEM),
    )(*args)

    # un-pack the lane-dense slab: row r, lane-group j holds token j*rows + r
    states = (states.reshape(LAYERS + 1, rows, g, D)
                    .transpose(0, 2, 1, 3)
                    .reshape(LAYERS + 1, B, T, D))
    inner_tbd = jnp.transpose(states, (0, 2, 1, 3))                        # (L+1,T,B,D)
    inner_states = [inner_tbd[i] for i in range(LAYERS + 1)]
    sentence_rep = states[LAYERS, :, 0, :]
    return inner_states, sentence_rep


# ----------------------------- main -------------------------------------------
if __name__ == "__main__":
    key = jax.random.PRNGKey(0)
    pkey, tkey, skey = jax.random.split(key, 3)
    params = init_params(pkey)
    kparams = prepare_kernel_params(params)

    B, T = 2, 8
    tokens = jax.random.randint(tkey, (B, T), 2, VOCAB)
    tokens = tokens.at[:, -2:].set(PAD_IDX)          # include padding to exercise the mask
    segment_labels = jax.random.randint(skey, (B, T), 0, NUM_SEG)

    inner_states, sentence_rep = forward(kparams, tokens, segment_labels)
    jax.block_until_ready(sentence_rep)
    jax.block_until_ready(inner_states)
    assert sentence_rep.shape == (B, D)
    assert len(inner_states) == LAYERS + 1 and inner_states[0].shape == (T, B, D)
    print("KERNEL_OK")
</pallas_src>

<mosaic_0001>
module attributes {stable_mosaic.version = 11 : i64} {
  func.func @_fused_encoder_kernel(%arg0: memref<16x64xf32, #tpu.memory_space<vmem>>, %arg1: memref<8x1x8xf32, #tpu.memory_space<vmem>>, %arg2: memref<64x32xf32, #tpu.memory_space<vmem>>, %arg3: memref<2x4x32x32xf32, #tpu.memory_space<vmem>>, %arg4: memref<2x32x64xf32, #tpu.memory_space<vmem>>, %arg5: memref<2x64x32xf32, #tpu.memory_space<vmem>>, %arg6: memref<2x9x32xf32, #tpu.memory_space<vmem>>, %arg7: memref<2x1x64xf32, #tpu.memory_space<vmem>>, %arg8: memref<3x4x128xf32, #tpu.memory_space<vmem>>) attributes {dimension_semantics = [], scalar_prefetch = 0 : i64, scratch_operands = 0 : i64, tpu.core_type = #tpu.core_type<tc>} {
    %c0 = arith.constant 0 : index
    %c0_0 = arith.constant 0 : index
    %0 = vector.load %arg0[%c0, %c0_0] : memref<16x64xf32, #tpu.memory_space<vmem>>, vector<16x64xf32>
    %c0_1 = arith.constant 0 : index
    %c0_2 = arith.constant 0 : index
    %1 = vector.load %arg2[%c0_1, %c0_2] : memref<64x32xf32, #tpu.memory_space<vmem>>, vector<64x32xf32>
    %cst = arith.constant dense<0.000000e+00> : vector<16x32xf32>
    %2 = tpu.matmul %0, %1, %cst {dimension_numbers = #tpu.dot_dimension_numbers<[1], [0], [0], [1], [0, 0, 1, 1], [], []>} : vector<16x64xf32>, vector<64x32xf32>, vector<16x32xf32> -> vector<16x32xf32>
    %3 = vector.shape_cast %2 : vector<16x32xf32> to vector<4x4x32xf32>
    %4 = vector.extract_strided_slice %3 {offsets = [0, 0, 0], sizes = [1, 4, 32], strides = [1, 1, 1]} : vector<4x4x32xf32> to vector<1x4x32xf32>
    %5 = vector.shape_cast %4 : vector<1x4x32xf32> to vector<4x32xf32>
    %6 = vector.extract_strided_slice %3 {offsets = [1, 0, 0], sizes = [1, 4, 32], strides = [1, 1, 1]} : vector<4x4x32xf32> to vector<1x4x32xf32>
    %7 = vector.shape_cast %6 : vector<1x4x32xf32> to vector<4x32xf32>
    %8 = vector.extract_strided_slice %3 {offsets = [2, 0, 0], sizes = [1, 4, 32], strides = [1, 1, 1]} : vector<4x4x32xf32> to vector<1x4x32xf32>
    %9 = vector.shape_cast %8 : vector<1x4x32xf32> to vector<4x32xf32>
    %10 = vector.extract_strided_slice %3 {offsets = [3, 0, 0], sizes = [1, 4, 32], strides = [1, 1, 1]} : vector<4x4x32xf32> to vector<1x4x32xf32>
    %11 = vector.shape_cast %10 : vector<1x4x32xf32> to vector<4x32xf32>
    %12 = tpu.concatenate %5, %7, %9, %11 in 1 : vector<4x32xf32>, vector<4x32xf32>, vector<4x32xf32>, vector<4x32xf32> -> vector<4x128xf32>
    %c0_3 = arith.constant 0 : index
    %c0_4 = arith.constant 0 : index
    %c0_5 = arith.constant 0 : index
    %13 = vector.load %arg8[%c0_3, %c0_4, %c0_5] : memref<3x4x128xf32, #tpu.memory_space<vmem>>, vector<1x4x128xf32>
    %14 = vector.shape_cast %13 : vector<1x4x128xf32> to vector<4x128xf32>
    %15 = vector.shape_cast %12 : vector<4x128xf32> to vector<1x4x128xf32>
    tpu.vector_store %arg8[%c0_3, %c0_4, %c0_5], %15 {strides = array<i32>} : memref<3x4x128xf32, #tpu.memory_space<vmem>>, vector<1x4x128xf32>,
    %c0_6 = arith.constant 0 : index
    %c0_7 = arith.constant 0 : index
    %c0_8 = arith.constant 0 : index
    %16 = vector.load %arg1[%c0_6, %c0_7, %c0_8] : memref<8x1x8xf32, #tpu.memory_space<vmem>>, vector<8x1x8xf32>
    %c0_9 = arith.constant 0 : index
    %c0_10 = arith.constant 0 : index
    %c0_11 = arith.constant 0 : index
    %c0_12 = arith.constant 0 : index
    %17 = vector.load %arg3[%c0_9, %c0_10, %c0_11, %c0_12] : memref<2x4x32x32xf32, #tpu.memory_space<vmem>>, vector<1x4x32x32xf32>
    %18 = vector.shape_cast %17 : vector<1x4x32x32xf32> to vector<4x32x32xf32>
    %c0_13 = arith.constant 0 : index
    %c0_14 = arith.constant 0 : index
    %c0_15 = arith.constant 0 : index
    %19 = vector.load %arg6[%c0_13, %c0_14, %c0_15] : memref<2x9x32xf32, #tpu.memory_space<vmem>>, vector<1x9x32xf32>
    %20 = vector.shape_cast %19 : vector<1x9x32xf32> to vector<9x32xf32>
    %c0_16 = arith.constant 0 : index
    %c0_17 = arith.constant 0 : index
    %c0_18 = arith.constant 0 : index
    %21 = vector.load %arg4[%c0_16, %c0_17, %c0_18] : memref<2x32x64xf32, #tpu.memory_space<vmem>>, vector<1x32x64xf32>
    %22 = vector.shape_cast %21 : vector<1x32x64xf32> to vector<32x64xf32>
    %c0_19 = arith.constant 0 : index
    %c0_20 = arith.constant 0 : index
    %c0_21 = arith.constant 0 : index
    %23 = vector.load %arg5[%c0_19, %c0_20, %c0_21] : memref<2x64x32xf32, #tpu.memory_space<vmem>>, vector<1x64x32xf32>
    %24 = vector.shape_cast %23 : vector<1x64x32xf32> to vector<64x32xf32>
    %c0_22 = arith.constant 0 : index
    %c0_23 = arith.constant 0 : index
    %c0_24 = arith.constant 0 : index
    %25 = vector.load %arg7[%c0_22, %c0_23, %c0_24] : memref<2x1x64xf32, #tpu.memory_space<vmem>>, vector<1x1x64xf32>
    %26 = vector.shape_cast %25 : vector<1x1x64xf32> to vector<1x64xf32>
    %27 = vector.extract_strided_slice %18 {offsets = [0, 0, 0], sizes = [1, 32, 32], strides = [1, 1, 1]} : vector<4x32x32xf32> to vector<1x32x32xf32>
    %28 = vector.shape_cast %27 : vector<1x32x32xf32> to vector<32x32xf32>
    %cst_25 = arith.constant dense<0.000000e+00> : vector<16x32xf32>
    %29 = tpu.matmul %2, %28, %cst_25 {dimension_numbers = #tpu.dot_dimension_numbers<[1], [0], [0], [1], [0, 0, 1, 1], [], []>} : vector<16x32xf32>, vector<32x32xf32>, vector<16x32xf32> -> vector<16x32xf32>
    %30 = vector.extract_strided_slice %20 {offsets = [0, 0], sizes = [1, 32], strides = [1, 1]} : vector<9x32xf32> to vector<1x32xf32>
    %31 = vector.shape_cast %30 : vector<1x32xf32> to vector<32xf32>
    %32 = vector.shape_cast %31 : vector<32xf32> to vector<1x32xf32>
    %33 = vector.broadcast %32 : vector<1x32xf32> to vector<16x32xf32>
    %34 = arith.addf %29, %33 : vector<16x32xf32>
    %35 = vector.extract_strided_slice %18 {offsets = [1, 0, 0], sizes = [1, 32, 32], strides = [1, 1, 1]} : vector<4x32x32xf32> to vector<1x32x32xf32>
    %36 = vector.shape_cast %35 : vector<1x32x32xf32> to vector<32x32xf32>
    %cst_26 = arith.constant dense<0.000000e+00> : vector<16x32xf32>
    %37 = tpu.matmul %2, %36, %cst_26 {dimension_numbers = #tpu.dot_dimension_numbers<[1], [0], [0], [1], [0, 0, 1, 1], [], []>} : vector<16x32xf32>, vector<32x32xf32>, vector<16x32xf32> -> vector<16x32xf32>
    %38 = vector.extract_strided_slice %20 {offsets = [1, 0], sizes = [1, 32], strides = [1, 1]} : vector<9x32xf32> to vector<1x32xf32>
    %39 = vector.shape_cast %38 : vector<1x32xf32> to vector<32xf32>
    %40 = vector.shape_cast %39 : vector<32xf32> to vector<1x32xf32>
    %41 = vector.broadcast %40 : vector<1x32xf32> to vector<16x32xf32>
    %42 = arith.addf %37, %41 : vector<16x32xf32>
    %43 = vector.extract_strided_slice %18 {offsets = [2, 0, 0], sizes = [1, 32, 32], strides = [1, 1, 1]} : vector<4x32x32xf32> to vector<1x32x32xf32>
    %44 = vector.shape_cast %43 : vector<1x32x32xf32> to vector<32x32xf32>
    %cst_27 = arith.constant dense<0.000000e+00> : vector<16x32xf32>
    %45 = tpu.matmul %2, %44, %cst_27 {dimension_numbers = #tpu.dot_dimension_numbers<[1], [0], [0], [1], [0, 0, 1, 1], [], []>} : vector<16x32xf32>, vector<32x32xf32>, vector<16x32xf32> -> vector<16x32xf32>
    %46 = vector.extract_strided_slice %20 {offsets = [2, 0], sizes = [1, 32], strides = [1, 1]} : vector<9x32xf32> to vector<1x32xf32>
    %47 = vector.shape_cast %46 : vector<1x32xf32> to vector<32xf32>
    %48 = vector.shape_cast %47 : vector<32xf32> to vector<1x32xf32>
    %49 = vector.broadcast %48 : vector<1x32xf32> to vector<16x32xf32>
    %50 = arith.addf %45, %49 : vector<16x32xf32>
    %51 = vector.shape_cast %34 : vector<16x32xf32> to vector<2x8x32xf32>
    %52 = vector.extract_strided_slice %51 {offsets = [0, 0, 0], sizes = [2, 8, 8], strides = [1, 1, 1]} : vector<2x8x32xf32> to vector<2x8x8xf32>
    %53 = vector.extract_strided_slice %51 {offsets = [0, 0, 8], sizes = [2, 8, 8], strides = [1, 1, 1]} : vector<2x8x32xf32> to vector<2x8x8xf32>
    %54 = vector.extract_strided_slice %51 {offsets = [0, 0, 16], sizes = [2, 8, 8], strides = [1, 1, 1]} : vector<2x8x32xf32> to vector<2x8x8xf32>
    %55 = vector.extract_strided_slice %51 {offsets = [0, 0, 24], sizes = [2, 8, 8], strides = [1, 1, 1]} : vector<2x8x32xf32> to vector<2x8x8xf32>
    %56 = tpu.concatenate %52, %53, %54, %55 in 0 : vector<2x8x8xf32>, vector<2x8x8xf32>, vector<2x8x8xf32>, vector<2x8x8xf32> -> vector<8x8x8xf32>
    %57 = vector.shape_cast %42 : vector<16x32xf32> to vector<2x8x32xf32>
    %58 = vector.extract_strided_slice %57 {offsets = [0, 0, 0], sizes = [2, 8, 8], strides = [1, 1, 1]} : vector<2x8x32xf32> to vector<2x8x8xf32>
    %59 = vector.extract_strided_slice %57 {offsets = [0, 0, 8], sizes = [2, 8, 8], strides = [1, 1, 1]} : vector<2x8x32xf32> to vector<2x8x8xf32>
    %60 = vector.extract_strided_slice %57 {offsets = [0, 0, 16], sizes = [2, 8, 8], strides = [1, 1, 1]} : vector<2x8x32xf32> to vector<2x8x8xf32>
    %61 = vector.extract_strided_slice %57 {offsets = [0, 0, 24], sizes = [2, 8, 8], strides = [1, 1, 1]} : vector<2x8x32xf32> to vector<2x8x8xf32>
    %62 = tpu.concatenate %58, %59, %60, %61 in 0 : vector<2x8x8xf32>, vector<2x8x8xf32>, vector<2x8x8xf32>, vector<2x8x8xf32> -> vector<8x8x8xf32>
    %63 = vector.shape_cast %50 : vector<16x32xf32> to vector<2x8x32xf32>
    %64 = vector.extract_strided_slice %63 {offsets = [0, 0, 0], sizes = [2, 8, 8], strides = [1, 1, 1]} : vector<2x8x32xf32> to vector<2x8x8xf32>
    %65 = vector.extract_strided_slice %63 {offsets = [0, 0, 8], sizes = [2, 8, 8], strides = [1, 1, 1]} : vector<2x8x32xf32> to vector<2x8x8xf32>
    %66 = vector.extract_strided_slice %63 {offsets = [0, 0, 16], sizes = [2, 8, 8], strides = [1, 1, 1]} : vector<2x8x32xf32> to vector<2x8x8xf32>
    %67 = vector.extract_strided_slice %63 {offsets = [0, 0, 24], sizes = [2, 8, 8], strides = [1, 1, 1]} : vector<2x8x32xf32> to vector<2x8x8xf32>
    %68 = tpu.concatenate %64, %65, %66, %67 in 0 : vector<2x8x8xf32>, vector<2x8x8xf32>, vector<2x8x8xf32>, vector<2x8x8xf32> -> vector<8x8x8xf32>
    "tpu.trace_start"() <{level = 10 : i32, message = "btd,bsd->bts"}> : () -> ()
    %cst_28 = arith.constant dense<0.000000e+00> : vector<8x8x8xf32>
    %69 = tpu.matmul %56, %62, %cst_28 {dimension_numbers = #tpu.dot_dimension_numbers<[2], [2], [1], [1], [0, 0, 0, 1, 1, 1], [0], [0]>} : vector<8x8x8xf32>, vector<8x8x8xf32>, vector<8x8x8xf32> -> vector<8x8x8xf32>
    "tpu.trace_stop"() : () -> ()
    %70 = vector.broadcast %16 : vector<8x1x8xf32> to vector<8x8x8xf32>
    %71 = arith.addf %69, %70 : vector<8x8x8xf32>
    %cst_29 = arith.constant dense<0xFF800000> : vector<8x8xf32>
    %72 = vector.multi_reduction <maximumf>, %71, %cst_29 [2] : vector<8x8x8xf32> to vector<8x8xf32>
    %73 = vector.shape_cast %72 : vector<8x8xf32> to vector<8x8x1xf32>
    %74 = vector.broadcast %73 : vector<8x8x1xf32> to vector<8x8x8xf32>
    %75 = arith.subf %71, %74 : vector<8x8x8xf32>
    %76 = math.exp %75 : vector<8x8x8xf32>
    %cst_30 = arith.constant dense<0.000000e+00> : vector<8x8xf32>
    %77 = vector.multi_reduction <add>, %76, %cst_30 [2] : vector<8x8x8xf32> to vector<8x8xf32>
    %78 = vector.shape_cast %77 : vector<8x8xf32> to vector<8x8x1xf32>
    %79 = tpu.reciprocal %78 {approx = true} : vector<8x8x1xf32> -> vector<8x8x1xf32>
    %80 = vector.broadcast %79 : vector<8x8x1xf32> to vector<8x8x8xf32>
    %81 = arith.mulf %76, %80 : vector<8x8x8xf32>
    "tpu.trace_start"() <{level = 10 : i32, message = "bts,bsd->btd"}> : () -> ()
    %cst_31 = arith.constant dense<0.000000e+00> : vector<8x8x8xf32>
    %82 = tpu.matmul %81, %68, %cst_31 {dimension_numbers = #tpu.dot_dimension_numbers<[2], [1], [1], [2], [0, 0, 0, 1, 1, 2], [0], [0]>} : vector<8x8x8xf32>, vector<8x8x8xf32>, vector<8x8x8xf32> -> vector<8x8x8xf32>
    "tpu.trace_stop"() : () -> ()
    %83 = vector.extract_strided_slice %82 {offsets = [0, 0, 0], sizes = [2, 8, 8], strides = [1, 1, 1]} : vector<8x8x8xf32> to vector<2x8x8xf32>
    %84 = vector.shape_cast %83 : vector<2x8x8xf32> to vector<16x8xf32>
    %85 = vector.extract_strided_slice %82 {offsets = [2, 0, 0], sizes = [2, 8, 8], strides = [1, 1, 1]} : vector<8x8x8xf32> to vector<2x8x8xf32>
    %86 = vector.shape_cast %85 : vector<2x8x8xf32> to vector<16x8xf32>
    %87 = vector.extract_strided_slice %82 {offsets = [4, 0, 0], sizes = [2, 8, 8], strides = [1, 1, 1]} : vector<8x8x8xf32> to vector<2x8x8xf32>
    %88 = vector.shape_cast %87 : vector<2x8x8xf32> to vector<16x8xf32>
    %89 = vector.extract_strided_slice %82 {offsets = [6, 0, 0], sizes = [2, 8, 8], strides = [1, 1, 1]} : vector<8x8x8xf32> to vector<2x8x8xf32>
    %90 = vector.shape_cast %89 : vector<2x8x8xf32> to vector<16x8xf32>
    %91 = tpu.concatenate %84, %86, %88, %90 in 1 : vector<16x8xf32>, vector<16x8xf32>, vector<16x8xf32>, vector<16x8xf32> -> vector<16x32xf32>
    %92 = vector.extract_strided_slice %18 {offsets = [3, 0, 0], sizes = [1, 32, 32], strides = [1, 1, 1]} : vector<4x32x32xf32> to vector<1x32x32xf32>
    %93 = vector.shape_cast %92 : vector<1x32x32xf32> to vector<32x32xf32>
    %cst_32 = arith.constant dense<0.000000e+00> : vector<16x32xf32>
    %94 = tpu.matmul %91, %93, %cst_32 {dimension_numbers = #tpu.dot_dimension_numbers<[1], [0], [0], [1], [0, 0, 1, 1], [], []>} : vector<16x32xf32>, vector<32x32xf32>, vector<16x32xf32> -> vector<16x32xf32>
    %95 = vector.extract_strided_slice %20 {offsets = [3, 0], sizes = [1, 32], strides = [1, 1]} : vector<9x32xf32> to vector<1x32xf32>
    %96 = vector.shape_cast %95 : vector<1x32xf32> to vector<32xf32>
    %97 = vector.shape_cast %96 : vector<32xf32> to vector<1x32xf32>
    %98 = vector.broadcast %97 : vector<1x32xf32> to vector<16x32xf32>
    %99 = arith.addf %94, %98 : vector<16x32xf32>
    %100 = arith.addf %2, %99 : vector<16x32xf32>
    %101 = vector.extract_strided_slice %20 {offsets = [4, 0], sizes = [1, 32], strides = [1, 1]} : vector<9x32xf32> to vector<1x32xf32>
    %102 = vector.shape_cast %101 : vector<1x32xf32> to vector<32xf32>
    %103 = vector.extract_strided_slice %20 {offsets = [5, 0], sizes = [1, 32], strides = [1, 1]} : vector<9x32xf32> to vector<1x32xf32>
    %104 = vector.shape_cast %103 : vector<1x32xf32> to vector<32xf32>
    %cst_33 = arith.constant dense<0.000000e+00> : vector<16xf32>
    %105 = vector.multi_reduction <add>, %100, %cst_33 [1] : vector<16x32xf32> to vector<16xf32>
    %106 = vector.shape_cast %105 : vector<16xf32> to vector<16x1xf32>
    %cst_34 = arith.constant 3.200000e+01 : f32
    %107 = vector.broadcast %cst_34 : f32 to vector<16x1xf32>
    %108 = arith.divf %106, %107 : vector<16x1xf32>
    %109 = vector.broadcast %108 : vector<16x1xf32> to vector<16x32xf32>
    %110 = arith.subf %100, %109 : vector<16x32xf32>
    %111 = arith.mulf %110, %110 : vector<16x32xf32>
    %cst_35 = arith.constant dense<0.000000e+00> : vector<16xf32>
    %112 = vector.multi_reduction <add>, %111, %cst_35 [1] : vector<16x32xf32> to vector<16xf32>
    %113 = vector.shape_cast %112 : vector<16xf32> to vector<16x1xf32>
    %cst_36 = arith.constant 3.200000e+01 : f32
    %114 = vector.broadcast %cst_36 : f32 to vector<16x1xf32>
    %115 = arith.divf %113, %114 : vector<16x1xf32>
    %116 = vector.broadcast %108 : vector<16x1xf32> to vector<16x32xf32>
    %117 = arith.subf %100, %116 : vector<16x32xf32>
    %cst_37 = arith.constant 9.99999974E-6 : f32
    %118 = vector.broadcast %cst_37 : f32 to vector<16x1xf32>
    %119 = arith.addf %115, %118 : vector<16x1xf32>
    %120 = math.rsqrt %119 : vector<16x1xf32>
    %121 = vector.broadcast %120 : vector<16x1xf32> to vector<16x32xf32>
    %122 = arith.mulf %117, %121 : vector<16x32xf32>
    %123 = vector.shape_cast %102 : vector<32xf32> to vector<1x32xf32>
    %124 = vector.broadcast %123 : vector<1x32xf32> to vector<16x32xf32>
    %125 = arith.mulf %122, %124 : vector<16x32xf32>
    %126 = vector.shape_cast %104 : vector<32xf32> to vector<1x32xf32>
    %127 = vector.broadcast %126 : vector<1x32xf32> to vector<16x32xf32>
    %128 = arith.addf %125, %127 : vector<16x32xf32>
    %cst_38 = arith.constant dense<0.000000e+00> : vector<16x64xf32>
    %129 = tpu.matmul %128, %22, %cst_38 {dimension_numbers = #tpu.dot_dimension_numbers<[1], [0], [0], [1], [0, 0, 1, 1], [], []>} : vector<16x32xf32>, vector<32x64xf32>, vector<16x64xf32> -> vector<16x64xf32>
    %130 = vector.broadcast %26 : vector<1x64xf32> to vector<16x64xf32>
    %131 = arith.addf %129, %130 : vector<16x64xf32>
    %cst_39 = arith.constant 0.000000e+00 : f32
    %132 = vector.broadcast %cst_39 : f32 to vector<16x64xf32>
    %133 = arith.maximumf %131, %132 : vector<16x64xf32>
    %cst_40 = arith.constant dense<0.000000e+00> : vector<16x32xf32>
    %134 = tpu.matmul %133, %24, %cst_40 {dimension_numbers = #tpu.dot_dimension_numbers<[1], [0], [0], [1], [0, 0, 1, 1], [], []>} : vector<16x64xf32>, vector<64x32xf32>, vector<16x32xf32> -> vector<16x32xf32>
    %135 = vector.extract_strided_slice %20 {offsets = [6, 0], sizes = [1, 32], strides = [1, 1]} : vector<9x32xf32> to vector<1x32xf32>
    %136 = vector.shape_cast %135 : vector<1x32xf32> to vector<32xf32>
    %137 = vector.shape_cast %136 : vector<32xf32> to vector<1x32xf32>
    %138 = vector.broadcast %137 : vector<1x32xf32> to vector<16x32xf32>
    %139 = arith.addf %134, %138 : vector<16x32xf32>
    %140 = arith.addf %128, %139 : vector<16x32xf32>
    %141 = vector.extract_strided_slice %20 {offsets = [7, 0], sizes = [1, 32], strides = [1, 1]} : vector<9x32xf32> to vector<1x32xf32>
    %142 = vector.shape_cast %141 : vector<1x32xf32> to vector<32xf32>
    %143 = vector.extract_strided_slice %20 {offsets = [8, 0], sizes = [1, 32], strides = [1, 1]} : vector<9x32xf32> to vector<1x32xf32>
    %144 = vector.shape_cast %143 : vector<1x32xf32> to vector<32xf32>
    %cst_41 = arith.constant dense<0.000000e+00> : vector<16xf32>
    %145 = vector.multi_reduction <add>, %140, %cst_41 [1] : vector<16x32xf32> to vector<16xf32>
    %146 = vector.shape_cast %145 : vector<16xf32> to vector<16x1xf32>
    %cst_42 = arith.constant 3.200000e+01 : f32
    %147 = vector.broadcast %cst_42 : f32 to vector<16x1xf32>
    %148 = arith.divf %146, %147 : vector<16x1xf32>
    %149 = vector.broadcast %148 : vector<16x1xf32> to vector<16x32xf32>
    %150 = arith.subf %140, %149 : vector<16x32xf32>
    %151 = arith.mulf %150, %150 : vector<16x32xf32>
    %cst_43 = arith.constant dense<0.000000e+00> : vector<16xf32>
    %152 = vector.multi_reduction <add>, %151, %cst_43 [1] : vector<16x32xf32> to vector<16xf32>
    %153 = vector.shape_cast %152 : vector<16xf32> to vector<16x1xf32>
    %cst_44 = arith.constant 3.200000e+01 : f32
    %154 = vector.broadcast %cst_44 : f32 to vector<16x1xf32>
    %155 = arith.divf %153, %154 : vector<16x1xf32>
    %156 = vector.broadcast %148 : vector<16x1xf32> to vector<16x32xf32>
    %157 = arith.subf %140, %156 : vector<16x32xf32>
    %cst_45 = arith.constant 9.99999974E-6 : f32
    %158 = vector.broadcast %cst_45 : f32 to vector<16x1xf32>
    %159 = arith.addf %155, %158 : vector<16x1xf32>
    %160 = math.rsqrt %159 : vector<16x1xf32>
    %161 = vector.broadcast %160 : vector<16x1xf32> to vector<16x32xf32>
    %162 = arith.mulf %157, %161 : vector<16x32xf32>
    %163 = vector.shape_cast %142 : vector<32xf32> to vector<1x32xf32>
    %164 = vector.broadcast %163 : vector<1x32xf32> to vector<16x32xf32>
    %165 = arith.mulf %162, %164 : vector<16x32xf32>
    %166 = vector.shape_cast %144 : vector<32xf32> to vector<1x32xf32>
    %167 = vector.broadcast %166 : vector<1x32xf32> to vector<16x32xf32>
    %168 = arith.addf %165, %167 : vector<16x32xf32>
    %169 = vector.shape_cast %168 : vector<16x32xf32> to vector<4x4x32xf32>
    %170 = vector.extract_strided_slice %169 {offsets = [0, 0, 0], sizes = [1, 4, 32], strides = [1, 1, 1]} : vector<4x4x32xf32> to vector<1x4x32xf32>
    %171 = vector.shape_cast %170 : vector<1x4x32xf32> to vector<4x32xf32>
    %172 = vector.extract_strided_slice %169 {offsets = [1, 0, 0], sizes = [1, 4, 32], strides = [1, 1, 1]} : vector<4x4x32xf32> to vector<1x4x32xf32>
    %173 = vector.shape_cast %172 : vector<1x4x32xf32> to vector<4x32xf32>
    %174 = vector.extract_strided_slice %169 {offsets = [2, 0, 0], sizes = [1, 4, 32], strides = [1, 1, 1]} : vector<4x4x32xf32> to vector<1x4x32xf32>
    %175 = vector.shape_cast %174 : vector<1x4x32xf32> to vector<4x32xf32>
    %176 = vector.extract_strided_slice %169 {offsets = [3, 0, 0], sizes = [1, 4, 32], strides = [1, 1, 1]} : vector<4x4x32xf32> to vector<1x4x32xf32>
    %177 = vector.shape_cast %176 : vector<1x4x32xf32> to vector<4x32xf32>
    %178 = tpu.concatenate %171, %173, %175, %177 in 1 : vector<4x32xf32>, vector<4x32xf32>, vector<4x32xf32>, vector<4x32xf32> -> vector<4x128xf32>
    %c1 = arith.constant 1 : index
    %c0_46 = arith.constant 0 : index
    %c0_47 = arith.constant 0 : index
    %179 = vector.load %arg8[%c1, %c0_46, %c0_47] : memref<3x4x128xf32, #tpu.memory_space<vmem>>, vector<1x4x128xf32>
    %180 = vector.shape_cast %179 : vector<1x4x128xf32> to vector<4x128xf32>
    %181 = vector.shape_cast %178 : vector<4x128xf32> to vector<1x4x128xf32>
    tpu.vector_store %arg8[%c1, %c0_46, %c0_47], %181 {strides = array<i32>} : memref<3x4x128xf32, #tpu.memory_space<vmem>>, vector<1x4x128xf32>,
    %c1_48 = arith.constant 1 : index
    %c0_49 = arith.constant 0 : index
    %c0_50 = arith.constant 0 : index
    %c0_51 = arith.constant 0 : index
    %182 = vector.load %arg3[%c1_48, %c0_49, %c0_50, %c0_51] : memref<2x4x32x32xf32, #tpu.memory_space<vmem>>, vector<1x4x32x32xf32>
    %183 = vector.shape_cast %182 : vector<1x4x32x32xf32> to vector<4x32x32xf32>
    %c1_52 = arith.constant 1 : index
    %c0_53 = arith.constant 0 : index
    %c0_54 = arith.constant 0 : index
    %184 = vector.load %arg6[%c1_52, %c0_53, %c0_54] : memref<2x9x32xf32, #tpu.memory_space<vmem>>, vector<1x9x32xf32>
    %185 = vector.shape_cast %184 : vector<1x9x32xf32> to vector<9x32xf32>
    %c1_55 = arith.constant 1 : index
    %c0_56 = arith.constant 0 : index
    %c0_57 = arith.constant 0 : index
    %186 = vector.load %arg4[%c1_55, %c0_56, %c0_57] : memref<2x32x64xf32, #tpu.memory_space<vmem>>, vector<1x32x64xf32>
    %187 = vector.shape_cast %186 : vector<1x32x64xf32> to vector<32x64xf32>
    %c1_58 = arith.constant 1 : index
    %c0_59 = arith.constant 0 : index
    %c0_60 = arith.constant 0 : index
    %188 = vector.load %arg5[%c1_58, %c0_59, %c0_60] : memref<2x64x32xf32, #tpu.memory_space<vmem>>, vector<1x64x32xf32>
    %189 = vector.shape_cast %188 : vector<1x64x32xf32> to vector<64x32xf32>
    %c1_61 = arith.constant 1 : index
    %c0_62 = arith.constant 0 : index
    %c0_63 = arith.constant 0 : index
    %190 = vector.load %arg7[%c1_61, %c0_62, %c0_63] : memref<2x1x64xf32, #tpu.memory_space<vmem>>, vector<1x1x64xf32>
    %191 = vector.shape_cast %190 : vector<1x1x64xf32> to vector<1x64xf32>
    %192 = vector.extract_strided_slice %183 {offsets = [0, 0, 0], sizes = [1, 32, 32], strides = [1, 1, 1]} : vector<4x32x32xf32> to vector<1x32x32xf32>
    %193 = vector.shape_cast %192 : vector<1x32x32xf32> to vector<32x32xf32>
    %cst_64 = arith.constant dense<0.000000e+00> : vector<16x32xf32>
    %194 = tpu.matmul %168, %193, %cst_64 {dimension_numbers = #tpu.dot_dimension_numbers<[1], [0], [0], [1], [0, 0, 1, 1], [], []>} : vector<16x32xf32>, vector<32x32xf32>, vector<16x32xf32> -> vector<16x32xf32>
    %195 = vector.extract_strided_slice %185 {offsets = [0, 0], sizes = [1, 32], strides = [1, 1]} : vector<9x32xf32> to vector<1x32xf32>
    %196 = vector.shape_cast %195 : vector<1x32xf32> to vector<32xf32>
    %197 = vector.shape_cast %196 : vector<32xf32> to vector<1x32xf32>
    %198 = vector.broadcast %197 : vector<1x32xf32> to vector<16x32xf32>
    %199 = arith.addf %194, %198 : vector<16x32xf32>
    %200 = vector.extract_strided_slice %183 {offsets = [1, 0, 0], sizes = [1, 32, 32], strides = [1, 1, 1]} : vector<4x32x32xf32> to vector<1x32x32xf32>
    %201 = vector.shape_cast %200 : vector<1x32x32xf32> to vector<32x32xf32>
    %cst_65 = arith.constant dense<0.000000e+00> : vector<16x32xf32>
    %202 = tpu.matmul %168, %201, %cst_65 {dimension_numbers = #tpu.dot_dimension_numbers<[1], [0], [0], [1], [0, 0, 1, 1], [], []>} : vector<16x32xf32>, vector<32x32xf32>, vector<16x32xf32> -> vector<16x32xf32>
    %203 = vector.extract_strided_slice %185 {offsets = [1, 0], sizes = [1, 32], strides = [1, 1]} : vector<9x32xf32> to vector<1x32xf32>
    %204 = vector.shape_cast %203 : vector<1x32xf32> to vector<32xf32>
    %205 = vector.shape_cast %204 : vector<32xf32> to vector<1x32xf32>
    %206 = vector.broadcast %205 : vector<1x32xf32> to vector<16x32xf32>
    %207 = arith.addf %202, %206 : vector<16x32xf32>
    %208 = vector.extract_strided_slice %183 {offsets = [2, 0, 0], sizes = [1, 32, 32], strides = [1, 1, 1]} : vector<4x32x32xf32> to vector<1x32x32xf32>
    %209 = vector.shape_cast %208 : vector<1x32x32xf32> to vector<32x32xf32>
    %cst_66 = arith.constant dense<0.000000e+00> : vector<16x32xf32>
    %210 = tpu.matmul %168, %209, %cst_66 {dimension_numbers = #tpu.dot_dimension_numbers<[1], [0], [0], [1], [0, 0, 1, 1], [], []>} : vector<16x32xf32>, vector<32x32xf32>, vector<16x32xf32> -> vector<16x32xf32>
    %211 = vector.extract_strided_slice %185 {offsets = [2, 0], sizes = [1, 32], strides = [1, 1]} : vector<9x32xf32> to vector<1x32xf32>
    %212 = vector.shape_cast %211 : vector<1x32xf32> to vector<32xf32>
    %213 = vector.shape_cast %212 : vector<32xf32> to vector<1x32xf32>
    %214 = vector.broadcast %213 : vector<1x32xf32> to vector<16x32xf32>
    %215 = arith.addf %210, %214 : vector<16x32xf32>
    %216 = vector.shape_cast %199 : vector<16x32xf32> to vector<2x8x32xf32>
    %217 = vector.extract_strided_slice %216 {offsets = [0, 0, 0], sizes = [2, 8, 8], strides = [1, 1, 1]} : vector<2x8x32xf32> to vector<2x8x8xf32>
    %218 = vector.extract_strided_slice %216 {offsets = [0, 0, 8], sizes = [2, 8, 8], strides = [1, 1, 1]} : vector<2x8x32xf32> to vector<2x8x8xf32>
    %219 = vector.extract_strided_slice %216 {offsets = [0, 0, 16], sizes = [2, 8, 8], strides = [1, 1, 1]} : vector<2x8x32xf32> to vector<2x8x8xf32>
    %220 = vector.extract_strided_slice %216 {offsets = [0, 0, 24], sizes = [2, 8, 8], strides = [1, 1, 1]} : vector<2x8x32xf32> to vector<2x8x8xf32>
    %221 = tpu.concatenate %217, %218, %219, %220 in 0 : vector<2x8x8xf32>, vector<2x8x8xf32>, vector<2x8x8xf32>, vector<2x8x8xf32> -> vector<8x8x8xf32>
    %222 = vector.shape_cast %207 : vector<16x32xf32> to vector<2x8x32xf32>
    %223 = vector.extract_strided_slice %222 {offsets = [0, 0, 0], sizes = [2, 8, 8], strides = [1, 1, 1]} : vector<2x8x32xf32> to vector<2x8x8xf32>
    %224 = vector.extract_strided_slice %222 {offsets = [0, 0, 8], sizes = [2, 8, 8], strides = [1, 1, 1]} : vector<2x8x32xf32> to vector<2x8x8xf32>
    %225 = vector.extract_strided_slice %222 {offsets = [0, 0, 16], sizes = [2, 8, 8], strides = [1, 1, 1]} : vector<2x8x32xf32> to vector<2x8x8xf32>
    %226 = vector.extract_strided_slice %222 {offsets = [0, 0, 24], sizes = [2, 8, 8], strides = [1, 1, 1]} : vector<2x8x32xf32> to vector<2x8x8xf32>
    %227 = tpu.concatenate %223, %224, %225, %226 in 0 : vector<2x8x8xf32>, vector<2x8x8xf32>, vector<2x8x8xf32>, vector<2x8x8xf32> -> vector<8x8x8xf32>
    %228 = vector.shape_cast %215 : vector<16x32xf32> to vector<2x8x32xf32>
    %229 = vector.extract_strided_slice %228 {offsets = [0, 0, 0], sizes = [2, 8, 8], strides = [1, 1, 1]} : vector<2x8x32xf32> to vector<2x8x8xf32>
    %230 = vector.extract_strided_slice %228 {offsets = [0, 0, 8], sizes = [2, 8, 8], strides = [1, 1, 1]} : vector<2x8x32xf32> to vector<2x8x8xf32>
    %231 = vector.extract_strided_slice %228 {offsets = [0, 0, 16], sizes = [2, 8, 8], strides = [1, 1, 1]} : vector<2x8x32xf32> to vector<2x8x8xf32>
    %232 = vector.extract_strided_slice %228 {offsets = [0, 0, 24], sizes = [2, 8, 8], strides = [1, 1, 1]} : vector<2x8x32xf32> to vector<2x8x8xf32>
    %233 = tpu.concatenate %229, %230, %231, %232 in 0 : vector<2x8x8xf32>, vector<2x8x8xf32>, vector<2x8x8xf32>, vector<2x8x8xf32> -> vector<8x8x8xf32>
    "tpu.trace_start"() <{level = 10 : i32, message = "btd,bsd->bts"}> : () -> ()
    %cst_67 = arith.constant dense<0.000000e+00> : vector<8x8x8xf32>
    %234 = tpu.matmul %221, %227, %cst_67 {dimension_numbers = #tpu.dot_dimension_numbers<[2], [2], [1], [1], [0, 0, 0, 1, 1, 1], [0], [0]>} : vector<8x8x8xf32>, vector<8x8x8xf32>, vector<8x8x8xf32> -> vector<8x8x8xf32>
    "tpu.trace_stop"() : () -> ()
    %235 = vector.broadcast %16 : vector<8x1x8xf32> to vector<8x8x8xf32>
    %236 = arith.addf %234, %235 : vector<8x8x8xf32>
    %cst_68 = arith.constant dense<0xFF800000> : vector<8x8xf32>
    %237 = vector.multi_reduction <maximumf>, %236, %cst_68 [2] : vector<8x8x8xf32> to vector<8x8xf32>
    %238 = vector.shape_cast %237 : vector<8x8xf32> to vector<8x8x1xf32>
    %239 = vector.broadcast %238 : vector<8x8x1xf32> to vector<8x8x8xf32>
    %240 = arith.subf %236, %239 : vector<8x8x8xf32>
    %241 = math.exp %240 : vector<8x8x8xf32>
    %cst_69 = arith.constant dense<0.000000e+00> : vector<8x8xf32>
    %242 = vector.multi_reduction <add>, %241, %cst_69 [2] : vector<8x8x8xf32> to vector<8x8xf32>
    %243 = vector.shape_cast %242 : vector<8x8xf32> to vector<8x8x1xf32>
    %244 = tpu.reciprocal %243 {approx = true} : vector<8x8x1xf32> -> vector<8x8x1xf32>
    %245 = vector.broadcast %244 : vector<8x8x1xf32> to vector<8x8x8xf32>
    %246 = arith.mulf %241, %245 : vector<8x8x8xf32>
    "tpu.trace_start"() <{level = 10 : i32, message = "bts,bsd->btd"}> : () -> ()
    %cst_70 = arith.constant dense<0.000000e+00> : vector<8x8x8xf32>
    %247 = tpu.matmul %246, %233, %cst_70 {dimension_numbers = #tpu.dot_dimension_numbers<[2], [1], [1], [2], [0, 0, 0, 1, 1, 2], [0], [0]>} : vector<8x8x8xf32>, vector<8x8x8xf32>, vector<8x8x8xf32> -> vector<8x8x8xf32>
    "tpu.trace_stop"() : () -> ()
    %248 = vector.extract_strided_slice %247 {offsets = [0, 0, 0], sizes = [2, 8, 8], strides = [1, 1, 1]} : vector<8x8x8xf32> to vector<2x8x8xf32>
    %249 = vector.shape_cast %248 : vector<2x8x8xf32> to vector<16x8xf32>
    %250 = vector.extract_strided_slice %247 {offsets = [2, 0, 0], sizes = [2, 8, 8], strides = [1, 1, 1]} : vector<8x8x8xf32> to vector<2x8x8xf32>
    %251 = vector.shape_cast %250 : vector<2x8x8xf32> to vector<16x8xf32>
    %252 = vector.extract_strided_slice %247 {offsets = [4, 0, 0], sizes = [2, 8, 8], strides = [1, 1, 1]} : vector<8x8x8xf32> to vector<2x8x8xf32>
    %253 = vector.shape_cast %252 : vector<2x8x8xf32> to vector<16x8xf32>
    %254 = vector.extract_strided_slice %247 {offsets = [6, 0, 0], sizes = [2, 8, 8], strides = [1, 1, 1]} : vector<8x8x8xf32> to vector<2x8x8xf32>
    %255 = vector.shape_cast %254 : vector<2x8x8xf32> to vector<16x8xf32>
    %256 = tpu.concatenate %249, %251, %253, %255 in 1 : vector<16x8xf32>, vector<16x8xf32>, vector<16x8xf32>, vector<16x8xf32> -> vector<16x32xf32>
    %257 = vector.extract_strided_slice %183 {offsets = [3, 0, 0], sizes = [1, 32, 32], strides = [1, 1, 1]} : vector<4x32x32xf32> to vector<1x32x32xf32>
    %258 = vector.shape_cast %257 : vector<1x32x32xf32> to vector<32x32xf32>
    %cst_71 = arith.constant dense<0.000000e+00> : vector<16x32xf32>
    %259 = tpu.matmul %256, %258, %cst_71 {dimension_numbers = #tpu.dot_dimension_numbers<[1], [0], [0], [1], [0, 0, 1, 1], [], []>} : vector<16x32xf32>, vector<32x32xf32>, vector<16x32xf32> -> vector<16x32xf32>
    %260 = vector.extract_strided_slice %185 {offsets = [3, 0], sizes = [1, 32], strides = [1, 1]} : vector<9x32xf32> to vector<1x32xf32>
    %261 = vector.shape_cast %260 : vector<1x32xf32> to vector<32xf32>
    %262 = vector.shape_cast %261 : vector<32xf32> to vector<1x32xf32>
    %263 = vector.broadcast %262 : vector<1x32xf32> to vector<16x32xf32>
    %264 = arith.addf %259, %263 : vector<16x32xf32>
    %265 = arith.addf %168, %264 : vector<16x32xf32>
    %266 = vector.extract_strided_slice %185 {offsets = [4, 0], sizes = [1, 32], strides = [1, 1]} : vector<9x32xf32> to vector<1x32xf32>
    %267 = vector.shape_cast %266 : vector<1x32xf32> to vector<32xf32>
    %268 = vector.extract_strided_slice %185 {offsets = [5, 0], sizes = [1, 32], strides = [1, 1]} : vector<9x32xf32> to vector<1x32xf32>
    %269 = vector.shape_cast %268 : vector<1x32xf32> to vector<32xf32>
    %cst_72 = arith.constant dense<0.000000e+00> : vector<16xf32>
    %270 = vector.multi_reduction <add>, %265, %cst_72 [1] : vector<16x32xf32> to vector<16xf32>
    %271 = vector.shape_cast %270 : vector<16xf32> to vector<16x1xf32>
    %cst_73 = arith.constant 3.200000e+01 : f32
    %272 = vector.broadcast %cst_73 : f32 to vector<16x1xf32>
    %273 = arith.divf %271, %272 : vector<16x1xf32>
    %274 = vector.broadcast %273 : vector<16x1xf32> to vector<16x32xf32>
    %275 = arith.subf %265, %274 : vector<16x32xf32>
    %276 = arith.mulf %275, %275 : vector<16x32xf32>
    %cst_74 = arith.constant dense<0.000000e+00> : vector<16xf32>
    %277 = vector.multi_reduction <add>, %276, %cst_74 [1] : vector<16x32xf32> to vector<16xf32>
    %278 = vector.shape_cast %277 : vector<16xf32> to vector<16x1xf32>
    %cst_75 = arith.constant 3.200000e+01 : f32
    %279 = vector.broadcast %cst_75 : f32 to vector<16x1xf32>
    %280 = arith.divf %278, %279 : vector<16x1xf32>
    %281 = vector.broadcast %273 : vector<16x1xf32> to vector<16x32xf32>
    %282 = arith.subf %265, %281 : vector<16x32xf32>
    %cst_76 = arith.constant 9.99999974E-6 : f32
    %283 = vector.broadcast %cst_76 : f32 to vector<16x1xf32>
    %284 = arith.addf %280, %283 : vector<16x1xf32>
    %285 = math.rsqrt %284 : vector<16x1xf32>
    %286 = vector.broadcast %285 : vector<16x1xf32> to vector<16x32xf32>
    %287 = arith.mulf %282, %286 : vector<16x32xf32>
    %288 = vector.shape_cast %267 : vector<32xf32> to vector<1x32xf32>
    %289 = vector.broadcast %288 : vector<1x32xf32> to vector<16x32xf32>
    %290 = arith.mulf %287, %289 : vector<16x32xf32>
    %291 = vector.shape_cast %269 : vector<32xf32> to vector<1x32xf32>
    %292 = vector.broadcast %291 : vector<1x32xf32> to vector<16x32xf32>
    %293 = arith.addf %290, %292 : vector<16x32xf32>
    %cst_77 = arith.constant dense<0.000000e+00> : vector<16x64xf32>
    %294 = tpu.matmul %293, %187, %cst_77 {dimension_numbers = #tpu.dot_dimension_numbers<[1], [0], [0], [1], [0, 0, 1, 1], [], []>} : vector<16x32xf32>, vector<32x64xf32>, vector<16x64xf32> -> vector<16x64xf32>
    %295 = vector.broadcast %191 : vector<1x64xf32> to vector<16x64xf32>
    %296 = arith.addf %294, %295 : vector<16x64xf32>
    %cst_78 = arith.constant 0.000000e+00 : f32
    %297 = vector.broadcast %cst_78 : f32 to vector<16x64xf32>
    %298 = arith.maximumf %296, %297 : vector<16x64xf32>
    %cst_79 = arith.constant dense<0.000000e+00> : vector<16x32xf32>
    %299 = tpu.matmul %298, %189, %cst_79 {dimension_numbers = #tpu.dot_dimension_numbers<[1], [0], [0], [1], [0, 0, 1, 1], [], []>} : vector<16x64xf32>, vector<64x32xf32>, vector<16x32xf32> -> vector<16x32xf32>
    %300 = vector.extract_strided_slice %185 {offsets = [6, 0], sizes = [1, 32], strides = [1, 1]} : vector<9x32xf32> to vector<1x32xf32>
    %301 = vector.shape_cast %300 : vector<1x32xf32> to vector<32xf32>
    %302 = vector.shape_cast %301 : vector<32xf32> to vector<1x32xf32>
    %303 = vector.broadcast %302 : vector<1x32xf32> to vector<16x32xf32>
    %304 = arith.addf %299, %303 : vector<16x32xf32>
    %305 = arith.addf %293, %304 : vector<16x32xf32>
    %306 = vector.extract_strided_slice %185 {offsets = [7, 0], sizes = [1, 32], strides = [1, 1]} : vector<9x32xf32> to vector<1x32xf32>
    %307 = vector.shape_cast %306 : vector<1x32xf32> to vector<32xf32>
    %308 = vector.extract_strided_slice %185 {offsets = [8, 0], sizes = [1, 32], strides = [1, 1]} : vector<9x32xf32> to vector<1x32xf32>
    %309 = vector.shape_cast %308 : vector<1x32xf32> to vector<32xf32>
    %cst_80 = arith.constant dense<0.000000e+00> : vector<16xf32>
    %310 = vector.multi_reduction <add>, %305, %cst_80 [1] : vector<16x32xf32> to vector<16xf32>
    %311 = vector.shape_cast %310 : vector<16xf32> to vector<16x1xf32>
    %cst_81 = arith.constant 3.200000e+01 : f32
    %312 = vector.broadcast %cst_81 : f32 to vector<16x1xf32>
    %313 = arith.divf %311, %312 : vector<16x1xf32>
    %314 = vector.broadcast %313 : vector<16x1xf32> to vector<16x32xf32>
    %315 = arith.subf %305, %314 : vector<16x32xf32>
    %316 = arith.mulf %315, %315 : vector<16x32xf32>
    %cst_82 = arith.constant dense<0.000000e+00> : vector<16xf32>
    %317 = vector.multi_reduction <add>, %316, %cst_82 [1] : vector<16x32xf32> to vector<16xf32>
    %318 = vector.shape_cast %317 : vector<16xf32> to vector<16x1xf32>
    %cst_83 = arith.constant 3.200000e+01 : f32
    %319 = vector.broadcast %cst_83 : f32 to vector<16x1xf32>
    %320 = arith.divf %318, %319 : vector<16x1xf32>
    %321 = vector.broadcast %313 : vector<16x1xf32> to vector<16x32xf32>
    %322 = arith.subf %305, %321 : vector<16x32xf32>
    %cst_84 = arith.constant 9.99999974E-6 : f32
    %323 = vector.broadcast %cst_84 : f32 to vector<16x1xf32>
    %324 = arith.addf %320, %323 : vector<16x1xf32>
    %325 = math.rsqrt %324 : vector<16x1xf32>
    %326 = vector.broadcast %325 : vector<16x1xf32> to vector<16x32xf32>
    %327 = arith.mulf %322, %326 : vector<16x32xf32>
    %328 = vector.shape_cast %307 : vector<32xf32> to vector<1x32xf32>
    %329 = vector.broadcast %328 : vector<1x32xf32> to vector<16x32xf32>
    %330 = arith.mulf %327, %329 : vector<16x32xf32>
    %331 = vector.shape_cast %309 : vector<32xf32> to vector<1x32xf32>
    %332 = vector.broadcast %331 : vector<1x32xf32> to vector<16x32xf32>
    %333 = arith.addf %330, %332 : vector<16x32xf32>
    %334 = vector.shape_cast %333 : vector<16x32xf32> to vector<4x4x32xf32>
    %335 = vector.extract_strided_slice %334 {offsets = [0, 0, 0], sizes = [1, 4, 32], strides = [1, 1, 1]} : vector<4x4x32xf32> to vector<1x4x32xf32>
    %336 = vector.shape_cast %335 : vector<1x4x32xf32> to vector<4x32xf32>
    %337 = vector.extract_strided_slice %334 {offsets = [1, 0, 0], sizes = [1, 4, 32], strides = [1, 1, 1]} : vector<4x4x32xf32> to vector<1x4x32xf32>
    %338 = vector.shape_cast %337 : vector<1x4x32xf32> to vector<4x32xf32>
    %339 = vector.extract_strided_slice %334 {offsets = [2, 0, 0], sizes = [1, 4, 32], strides = [1, 1, 1]} : vector<4x4x32xf32> to vector<1x4x32xf32>
    %340 = vector.shape_cast %339 : vector<1x4x32xf32> to vector<4x32xf32>
    %341 = vector.extract_strided_slice %334 {offsets = [3, 0, 0], sizes = [1, 4, 32], strides = [1, 1, 1]} : vector<4x4x32xf32> to vector<1x4x32xf32>
    %342 = vector.shape_cast %341 : vector<1x4x32xf32> to vector<4x32xf32>
    %343 = tpu.concatenate %336, %338, %340, %342 in 1 : vector<4x32xf32>, vector<4x32xf32>, vector<4x32xf32>, vector<4x32xf32> -> vector<4x128xf32>
    %c2 = arith.constant 2 : index
    %c0_85 = arith.constant 0 : index
    %c0_86 = arith.constant 0 : index
    %344 = vector.load %arg8[%c2, %c0_85, %c0_86] : memref<3x4x128xf32, #tpu.memory_space<vmem>>, vector<1x4x128xf32>
    %345 = vector.shape_cast %344 : vector<1x4x128xf32> to vector<4x128xf32>
    %346 = vector.shape_cast %343 : vector<4x128xf32> to vector<1x4x128xf32>
    tpu.vector_store %arg8[%c2, %c0_85, %c0_86], %346 {strides = array<i32>} : memref<3x4x128xf32, #tpu.memory_space<vmem>>, vector<1x4x128xf32>,
    return
  }
}

</mosaic_0001>

<bundles_post_ra>
// kernel: forward.1
= control target key start
LH: loop header
LB: loop body
LE: loop exit
PB: predicated region body
PF: predicated region fallthrough
CT: control target
= control target key end

     0   :  { %vm39_vm0 = vcmask 523264   ;;  %vm134_vm1 = vcmask 261120   ;;  %v4970_v34 = vmov 0.0   ;;  %vm4971_vm2 = vmmov 0   ;;  %s4972_s27 = smov 120   ;;  %s4973_s28 = smov 112   ;;  %s5740_s2 = inlined_call_operand.vmem [shape: f32[64,32], index: 2, kind: input, shape index: {}]   ;;  %s5741_s0 = inlined_call_operand.vmem [shape: f32[16,64], index: 0, kind: input, shape index: {}]   ;;  %s5742_s3 = inlined_call_operand.vmem [shape: f32[2,4,32,32], index: 3, kind: input, shape index: {}]   ;;  %s5743_s6 = inlined_call_operand.vmem [shape: f32[2,9,32], index: 6, kind: input, shape index: {}]   ;;  %s5744_s1 = inlined_call_operand.vmem [shape: f32[8,1,8], index: 1, kind: input, shape index: {}]   ;;  %s5745_s4 = inlined_call_operand.vmem [shape: f32[2,32,64], index: 4, kind: input, shape index: {}]   ;;  %s5746_s5 = inlined_call_operand.vmem [shape: f32[2,64,32], index: 5, kind: input, shape index: {}]   ;;  %s5747_s7 = inlined_call_operand.vmem [shape: f32[2,1,64], index: 7, kind: input, shape index: {}]   ;;  %s5748_s8 = inlined_call_operand.vmem [shape: f32[3,4,128], index: 8, kind: output, shape index: {}]  }
   0x1   :  { %v31_v0 = vld [vmem:[%s5740_s2] sm:$0xff]  ;;  %v32_v1 = vld [vmem:[%s5740_s2 + $0x8] sm:$0xff]  ;;  %v33_v2 = vld [vmem:[%s5740_s2 + $0x10] sm:$0xff]  ;;  %v179_v35 = vlaneseq  ;;  %vm516_vm3 = vcmask 64512   ;;  %s4974_s29 = smov 104   ;;  %s4975_s10 = smov 8  }
   0x2   :  { %v4751_v3 = vpack.c.bf16 %v32_v1, %v31_v0  ;;  %v34_v4 = vld [vmem:[%s5740_s2 + $0x18] sm:$0xff]  ;;  %v35_v6 = vld [vmem:[%s5740_s2 + $0x20] sm:$0xff]  ;;  %v36_v7 = vld [vmem:[%s5740_s2 + $0x28] sm:$0xff]  ;;  %s4976_s11 = smov 16   ;;  %s4977_s12 = smov 24   ;;  %vm1807_vm4 = vcmask 130048  }
   0x3   :  { %v4755_v5 = vpack.c.bf16 %v34_v4, %v33_v2  ;;  %v29_v8 = vld [vmem:[%s5741_s0] sm:$0xff]  ;;  %v149_v10 = vld [vmem:[%s5742_s3 + $0x8] sm:$0xff]  ;;  %v150_v12 = vld [vmem:[%s5742_s3 + $0x10] sm:$0xff]  ;;  %v4759_v14 = vpack.c.bf16 %v36_v7, %v35_v6  ;;  %v5116_v36 = vshrl.u32 %v179_v35, 7  ;;  %vm1810_vm5 = vcmask 195584   ;;  %s4980_s13 = smov 96  }
   0x4   :  { %4752 = vmatprep.subr.bf16.mxu0 %v4751_v3  ;;  %4440 = vmatprep.mubr.msk.f32.mxu0 %vm39_vm0, %v29_v8  ;;  %v148_v9 = vld [vmem:[%s5742_s3] sm:$0xff]  ;;  %v151_v13 = vld [vmem:[%s5742_s3 + $0x18] sm:$0xff]  ;;  %v37_v16 = vld [vmem:[%s5740_s2 + $0x30] sm:$0xff]  ;;  %vm137_vm6 = vcmask 785408  }
   0x5   :  { %4754 = vmatpush3.bf16.msra.mxu0 %v4751_v3  ;;  %v4767_v11 = vpack.c.bf16 %v149_v10, %v148_v9  ;;  %v4771_v15 = vpack.c.bf16 %v151_v13, %v150_v12  ;;  %v38_v17 = vld [vmem:[%s5740_s2 + $0x38] sm:$0xff]  ;;  %v30_v19 = vld [vmem:[%s5741_s0 + $0x8] sm:$0xff]  ;;  %v152_v20 = vld [vmem:[%s5742_s3 + $0x20] sm:$0xff]  ;;  %v181_v37 = vsub.s32 0, %v5116_v36  ;;  %v264_v43 = vsub.s32 1, %v5116_v36 }
   0x6   :  { %4756 = vmatprep.subr.bf16.mxu0 %v4755_v5  ;;  %v4763_v18 = vpack.c.bf16 %v38_v17, %v37_v16  ;;  %v153_v21 = vld [vmem:[%s5742_s3 + $0x28] sm:$0xff]  ;;  %v154_v23 = vld [vmem:[%s5742_s3 + $0x30] sm:$0xff]  ;;  %v155_v24 = vld [vmem:[%s5742_s3 + $0x38] sm:$0xff]  ;;  %v343_v58 = vsub.s32 2, %v5116_v36 }
   0x7   :  { %4768 = vmatprep.subr.bf16.mxu1 %v4767_v11  ;;  %v4775_v22 = vpack.c.bf16 %v153_v21, %v152_v20  ;;  %v4779_v27 = vpack.c.bf16 %v155_v24, %v154_v23  ;;  %v156_v28 = vld [vmem:[%s5742_s3 + $0x40] sm:$0xff]  ;;  %v157_v29 = vld [vmem:[%s5742_s3 + $0x48] sm:$0xff]  ;;  %v158_v31 = vld [vmem:[%s5742_s3 + $0x50] sm:$0xff] }
   0x8   :  { %4770 = vmatpush3.bf16.msra.mxu1 %v4767_v11  ;;  %v4783_v30 = vpack.c.bf16 %v157_v29, %v156_v28  ;;  %v159_v32 = vld [vmem:[%s5742_s3 + $0x58] sm:$0xff]  ;;  %v5122_v38 = vld [vmem:[%s5743_s6] sm:$0xff] }
   0x9   :  { %4758 = vmatpush3.bf16.msra.mxu0 %v4755_v5  ;;  %4772 = vmatprep.subr.bf16.mxu1 %v4771_v15  ;;  %v4787_v33 = vpack.c.bf16 %v159_v32, %v158_v31  ;;  %v182_v39 = vrot.slane %v5122_v38, %v181_v37  ;;  %v265_v45 = vrot.slane %v5122_v38, %v264_v43  ;;  %v5198_v4 = vld [vmem:[%s5744_s1] ss:$0 sm:$0xff]  ;;  %v5204_v8 = vld [vmem:[%s5744_s1 + $0x1] ss:$0 sm:$0xff]  ;;  %v5212_v16 = vld [vmem:[%s5744_s1 + $0x2] ss:$0 sm:$0xff] }
   0xa   :  { %4760 = vmatprep.subr.bf16.mxu0 %v4759_v14  ;;  %v344_v61 = vrot.slane %v5122_v38, %v343_v58  ;;  %v5217_v17 = vld [vmem:[%s5744_s1 + $0x3] ss:$0 sm:$0xff]  ;;  %v5223_v23 = vld [vmem:[%s5744_s1 + $0x4] ss:$0 sm:$0xff]  ;;  %v5230_v28 = vld [vmem:[%s5744_s1 + $0x5] ss:$0 sm:$0xff] }
   0xc   :  { %4774 = vmatpush3.bf16.msra.mxu1 %v4771_v15 }
   0xd   :  { %4762 = vmatpush3.bf16.msra.mxu0 %v4759_v14  ;;  %4776 = vmatprep.subr.bf16.mxu1 %v4775_v22 }
   0xe   :  { %4764 = vmatprep.subr.bf16.mxu0 %v4763_v18 }
  0x11   :  { %4766 = vmatpush3.bf16.msra.mxu0 %v4763_v18 }
  0x12   :  { %4486 = vmatprep.subr.mxu0 %v4970_v34 }
  0x14   :  { %4441 = vmatmul.mubr.msk.f32.vlgmr.msra.gmra.mrb[0].mxu0 %vm39_vm0, %v30_v19 }
  0x15   :  { %4488 = vmatprep.mubr.msk.f32.mxu0 %vm4971_vm2, %v4970_v34 }
  0xe7   :  { %v5082_v25 = vpop.f32.mrb[0].mxu0 }
  0xe8   :  { %v5084_v26 = vpop.f32.mrb[1].mxu0 }
  0xe9   :  { %4451 = vmatprep.mubr.msk.f32.mxu1 %vm134_vm1, %v5084_v26 }
  0xea   :  { %4452 = vmatmul.mubr.msk.f32.vlgmr.msra.gmra.mrb[0].mxu1 %vm134_vm1, %v5082_v25 }
  0xeb   :  { %4778 = vmatpush3.bf16.msra.mxu1 %v4775_v22  ;;  %4462 = vmatprep.mubr.msk.f32.mxu1 %vm134_vm1, %v5084_v26 }
  0xec   :  { %4780 = vmatprep.subr.bf16.mxu1 %v4779_v27 }
  0xef   :  { %4782 = vmatpush3.bf16.msra.mxu1 %v4779_v27 }
  0xf0   :  { %4784 = vmatprep.subr.bf16.mxu1 %v4783_v30 }
  0xf2   :  { %4463 = vmatmul.mubr.msk.f32.vlgmr.msra.gmra.mrb[2].mxu1 %vm134_vm1, %v5082_v25 }
  0xf3   :  { %4786 = vmatpush3.bf16.msra.mxu1 %v4783_v30  ;;  %4473 = vmatprep.mubr.msk.f32.mxu1 %vm134_vm1, %v5084_v26 }
  0xf4   :  { %4788 = vmatprep.subr.bf16.mxu1 %v4787_v33 }
  0xf7   :  { %4790 = vmatpush3.bf16.msra.mxu1 %v4787_v33 }
  0xf8   :  { %4476 = vmatprep.subr.mxu1 %v4970_v34 }
  0xfa   :  { %4474 = vmatmul.mubr.msk.f32.vlgmr.msra.gmra.mrb[4].mxu1 %vm134_vm1, %v5082_v25 }
  0xfb   :  { %4478 = vmatprep.mubr.msk.f32.mxu1 %vm4971_vm2, %v4970_v34 }
 0x1bd   :  { %v4453_v40 = vpop.f32.mrb[0].mxu1 }
 0x1be   :  { %v259_v41 = vadd.f32 %v4453_v40, %v182_v39  ;;  %v253_v42 = vpop.f32.mrb[1].mxu1 }
 0x1bf   :  { %v254_v44 = vadd.f32 %v253_v42, %v182_v39  ;;  %v5244_v42 = vld [vmem:[%s5744_s1 + $0x7] ss:$0 sm:$0xff] }
 0x1c0   :  { %424 = vrot.lane.b32.xlu1 %v259_v41, %s4972_s27 }
 0x1c1   :  { %426 = vrot.lane.b32.xlu0 %v254_v44, %s4973_s28 }
 0x1c4   :  { %428 = vrot.lane.b32.xlu1 %v259_v41, %s4973_s28 }
 0x1c5   :  { %v4464_v46 = vpop.f32.mrb[2].mxu1 }
 0x1c6   :  { %v338_v47 = vadd.f32 %v4464_v46, %v265_v45  ;;  %v332_v48 = vpop.f32.mrb[3].mxu1 }
 0x1c7   :  { %v333_v49 = vadd.f32 %v332_v48, %v265_v45 }
 0x1c8   :  { %438 = vrot.lane.b32.xlu0 %v338_v47, %s4972_s27  ;;  %422 = vrot.lane.b32.xlu1 %v254_v44, %s4972_s27 }
 0x1c9   :  { %4477 = vmatpush3.xpose.msk.msra.mxu1 %vm516_vm3, %v333_v49 }
 0x1ca   :  { %4481 = vmatprep.subr.mxu1 %v4970_v34 }
 0x1cc   :  { %436 = vrot.lane.b32.xlu0 %v333_v49, %s4972_s27  ;;  %4479 = vmatmul.mubr.msk.f32.vlgmr.msra.gmra.mrb[6].mxu1 %vm516_vm3, %v254_v44 }
 0x1cd   :  { %v4475_v50 = vpop.f32.mrb[4].mxu1  ;;  %442 = vrot.lane.b32.xlu1 %v338_v47, %s4973_s28  ;;  %4482 = vmatpush3.xpose.msk.msra.mxu1 %vm516_vm3, %v338_v47 }
 0x1ce   :  { %v411_v51 = vpop.f32.mrb[5].mxu1  ;;  %4483 = vmatprep.mubr.msk.f32.mxu1 %vm4971_vm2, %v4970_v34  ;;  %4491 = vmatprep.subr.mxu1 %v4970_v34  ;;  %v5177_v0 = vadd.f32 %v4475_v50, %v344_v61 }
 0x1cf   :  { %v5187_v2 = vadd.f32 %v411_v51, %v344_v61 }
 0x1d0   :  { %440 = vrot.lane.b32.xlu0 %v333_v49, %s4973_s28  ;;  %4484 = vmatmul.mubr.msk.f32.vlgmr.msra.gmra.mrb[8].mxu1 %vm516_vm3, %v259_v41 }
 0x1d1   :  { %446 = vrot.lane.b32.xlu1 %v338_v47, %s4974_s29  ;;  %4493 = vmatprep.mubr.msk.f32.mxu1 %vm4971_vm2, %v4970_v34 }
 0x1d4   :  { %444 = vrot.lane.b32.xlu0 %v333_v49, %s4974_s29 }
 0x1d5   :  { %432 = vrot.lane.b32.xlu1 %v259_v41, %s4974_s29  ;;  %v5239_v41 = vld [vmem:[%s5744_s1 + $0x6] ss:$0 sm:$0xff] }
 0x1d8   :  { %430 = vrot.lane.b32.xlu0 %v254_v44, %s4974_s29 }
 0x232   :  { %v425_v52 = vpop.permute.xlu1 %424 }
 0x233   :  { %v427_v53 = vpop.permute.xlu0 %426 }
 0x236   :  { %v429_v54 = vpop.permute.xlu1 %428 }
 0x23a   :  { %v439_v55 = vpop.permute.xlu0 %438  ;;  %v423_v56 = vpop.permute.xlu1 %422 }
 0x23b   :  { %4492 = vmatpush3.xpose.msk.msra.mxu1 %vm516_vm3, %v439_v55 }
 0x23c   :  { %4501 = vmatprep.subr.mxu1 %v4970_v34 }
 0x23e   :  { %v437_v57 = vpop.permute.xlu0 %436  ;;  %4494 = vmatmul.mubr.msk.f32.vlgmr.msra.gmra.mrb[10].mxu1 %vm516_vm3, %v425_v52 }
 0x23f   :  { %4487 = vmatpush3.xpose.msk.msra.mxu0 %vm516_vm3, %v437_v57  ;;  %v443_v59 = vpop.permute.xlu1 %442  ;;  %4503 = vmatprep.mubr.msk.f32.mxu1 %vm4971_vm2, %v4970_v34 }
 0x240   :  { %4502 = vmatpush3.xpose.msk.msra.mxu1 %vm516_vm3, %v443_v59  ;;  %4496 = vmatprep.subr.mxu0 %v4970_v34 }
 0x241   :  { %4511 = vmatprep.subr.mxu1 %v4970_v34 }
 0x242   :  { %v441_v60 = vpop.permute.xlu0 %440  ;;  %4489 = vmatmul.mubr.msk.f32.vlgmr.msra.gmra.mrb[2].mxu0 %vm516_vm3, %v423_v56 }
 0x243   :  { %4497 = vmatpush3.xpose.msk.msra.mxu0 %vm516_vm3, %v441_v60  ;;  %v447_v62 = vpop.permute.xlu1 %446  ;;  %4504 = vmatmul.mubr.msk.f32.vlgmr.msra.gmra.mrb[12].mxu1 %vm516_vm3, %v429_v54 }
 0x244   :  { %4512 = vmatpush3.xpose.msk.msra.mxu1 %vm516_vm3, %v447_v62  ;;  %4498 = vmatprep.mubr.msk.f32.mxu0 %vm4971_vm2, %v4970_v34 }
 0x245   :  { %4506 = vmatprep.subr.mxu0 %v4970_v34  ;;  %4513 = vmatprep.mubr.msk.f32.mxu1 %vm4971_vm2, %v4970_v34 }
 0x246   :  { %v445_v63 = vpop.permute.xlu0 %444  ;;  %4499 = vmatmul.mubr.msk.f32.vlgmr.msra.gmra.mrb[4].mxu0 %vm516_vm3, %v427_v53  ;;  %4521 = vmatprep.subr.mxu1 %v4970_v34 }
 0x247   :  { %4507 = vmatpush3.xpose.msk.msra.mxu0 %vm516_vm3, %v445_v63  ;;  %v433_v1 = vpop.permute.xlu1 %432  ;;  %4508 = vmatprep.mubr.msk.f32.mxu0 %vm4971_vm2, %v4970_v34 }
 0x248   :  { %4514 = vmatmul.mubr.msk.f32.vlgmr.msra.gmra.mrb[14].mxu1 %vm516_vm3, %v433_v1  ;;  %4516 = vmatprep.subr.mxu0 %v4970_v34 }
 0x249   :  { %4522 = vmatpush3.msra.mxu1 %v5177_v0  ;;  %4523 = vmatprep.mubr.msk.f32.mxu1 %vm4971_vm2, %v4970_v34 }
 0x24a   :  { %v431_v3 = vpop.permute.xlu0 %430  ;;  %4531 = vmatprep.subr.mxu1 %v4970_v34 }
 0x24b   :  { %4509 = vmatmul.mubr.msk.f32.vlgmr.msra.gmra.mrb[6].mxu0 %vm516_vm3, %v431_v3 }
 0x24c   :  { %4517 = vmatpush3.msra.mxu0 %v5187_v2  ;;  %4518 = vmatprep.mubr.msk.f32.mxu0 %vm4971_vm2, %v4970_v34 }
 0x24d   :  { %4526 = vmatprep.subr.mxu0 %v4970_v34 }
 0x29f   :  { %v587_v5 = vpop.f32.mrb[6].mxu1 }
 0x2a0   :  { %v588_v6 = vadd.f32 %v5198_v4, %v587_v5  ;;  %v4480_v7 = vpop.f32.mrb[7].mxu1 }
 0x2a2   :  { %v1109_v9 = vsel %vm516_vm3, %v588_v6, -inf }
 0x2a3   :  { %1110 = vmax.xlane.f32.xlu0 %v1109_v9  ;;  %v661_v10 = vpop.f32.mrb[8].mxu1 }
 0x2a4   :  { %v662_v11 = vadd.f32 %v5204_v8, %v661_v10  ;;  %v4485_v12 = vpop.f32.mrb[9].mxu1 }
 0x2a6   :  { %v1112_v13 = vsel %vm516_vm3, %v662_v11, -inf }
 0x2a7   :  { %1113 = vmax.xlane.f32.xlu1 %v1112_v13 }
 0x311   :  { %v809_v14 = vpop.f32.mrb[10].mxu1 }
 0x312   :  { %v4495_v15 = vpop.f32.mrb[11].mxu1  ;;  %v810_v24 = vadd.f32 %v5217_v17, %v809_v14 }
 0x314   :  { %v1118_v40 = vsel %vm516_vm3, %v810_v24, -inf }
 0x315   :  { %v735_v18 = vpop.f32.mrb[2].mxu0 }
 0x316   :  { %v736_v19 = vadd.f32 %v5212_v16, %v735_v18  ;;  %v4490_v20 = vpop.f32.mrb[3].mxu0  ;;  %v957_v21 = vpop.f32.mrb[12].mxu1 }
 0x317   :  { %v4505_v22 = vpop.f32.mrb[13].mxu1  ;;  %v958_v33 = vadd.f32 %v5230_v28, %v957_v21 }
 0x318   :  { %v1115_v27 = vsel %vm516_vm3, %v736_v19, -inf }
 0x319   :  { %v883_v29 = vpop.f32.mrb[4].mxu0  ;;  %1116 = vmax.xlane.f32.xlu0 %v1115_v27  ;;  %v1124_v48 = vsel %vm516_vm3, %v958_v33, -inf }
 0x31a   :  { %v884_v30 = vadd.f32 %v5223_v23, %v883_v29  ;;  %v4500_v31 = vpop.f32.mrb[5].mxu0 }
 0x31b   :  { %v1105_v32 = vpop.f32.mrb[14].mxu1 }
 0x31c   :  { %v4515_v35 = vpop.f32.mrb[15].mxu1  ;;  %v1121_v39 = vsel %vm516_vm3, %v884_v30, -inf  ;;  %v1106_v47 = vadd.f32 %v5244_v42, %v1105_v32 }
 0x31d   :  { %1122 = vmax.xlane.f32.xlu1 %v1121_v39  ;;  %1119 = vmax.xlane.f32.xlu0 %v1118_v40 }
 0x31e   :  { %v1031_v44 = vpop.f32.mrb[6].mxu0  ;;  %v1130_v50 = vsel %vm516_vm3, %v1106_v47, -inf }
 0x31f   :  { %v1032_v45 = vadd.f32 %v5239_v41, %v1031_v44  ;;  %v4510_v46 = vpop.f32.mrb[7].mxu0 }
 0x321   :  { %1125 = vmax.xlane.f32.xlu0 %v1124_v48  ;;  %v1127_v49 = vsel %vm516_vm3, %v1032_v45, -inf }
 0x322   :  { %1128 = vmax.xlane.f32.xlu1 %v1127_v49 }
 0x325   :  { %1131 = vmax.xlane.f32.xlu0 %v1130_v50 }
 0x330   :  { %v1111_v53 = vpop.xlane.xlu0 %1110 }
 0x331   :  { %v1133_v55 = vsub.f32 %v588_v6, %v1111_v53 }
 0x333   :  { %450 = vrot.lane.b32.xlu1 %v5187_v2, %s4972_s27  ;;  %v1141_v56 = vmul.f32 1.442695, %v1133_v55 }
 0x334   :  { %v1114_v51 = vpop.xlane.xlu1 %1113 }
 0x335   :  { %v1134_v52 = vsub.f32 %v662_v11, %v1114_v51 }
 0x337   :  { %456 = vrot.lane.b32.xlu1 %v5187_v2, %s4973_s28  ;;  %v1143_v54 = vmul.f32 1.442695, %v1134_v52 }
 0x339   :  { %4890 = vpow2.f32 %v1143_v54 }
 0x33a   :  { %4892 = vpow2.f32 %v1141_v56 }
 0x33b   :  { %458 = vrot.lane.b32.xlu1 %v5177_v0, %s4973_s28  ;;  %452 = vrot.lane.b32.xlu0 %v5177_v0, %s4972_s27 }
 0x343   :  { %v4891_v57 = vpop.eup %4890 }
 0x344   :  { %v1160_v59 = vsel %vm516_vm3, %v4891_v57, 0.0  ;;  %v4893_v60 = vpop.eup %4892 }
 0x345   :  { %v1157_v61 = vsel %vm516_vm3, %v4893_v60, 0.0 }
 0x35a   :  { %1161 = vadd.xlane.f32.xlu0 %v1160_v59 }
 0x35f   :  { %1158 = vadd.xlane.f32.xlu1 %v1157_v61 }
 0x3a6   :  { %v1117_v62 = vpop.xlane.xlu0 %1116 }
 0x3a7   :  { %v1135_v63 = vsub.f32 %v736_v19, %v1117_v62 }
 0x3a9   :  { %v1145_v1 = vmul.f32 1.442695, %v1135_v63 }
 0x3aa   :  { %v1123_v3 = vpop.xlane.xlu1 %1122  ;;  %v1120_v5 = vpop.xlane.xlu0 %1119 }
 0x3ab   :  { %4894 = vpow2.f32 %v1145_v1  ;;  %v1137_v7 = vsub.f32 %v884_v30, %v1123_v3  ;;  %v1136_v9 = vsub.f32 %v810_v24, %v1120_v5 }
 0x3ad   :  { %v1149_v6 = vmul.f32 1.442695, %v1137_v7  ;;  %v1147_v10 = vmul.f32 1.442695, %v1136_v9 }
 0x3ae   :  { %v1126_v11 = vpop.xlane.xlu0 %1125 }
 0x3af   :  { %4896 = vpow2.f32 %v1149_v6  ;;  %v1138_v12 = vsub.f32 %v958_v33, %v1126_v11  ;;  %v1129_v13 = vpop.xlane.xlu1 %1128 }
 0x3b0   :  { %4898 = vpow2.f32 %v1147_v10  ;;  %v1139_v14 = vsub.f32 %v1032_v45, %v1129_v13 }
 0x3b1   :  { %v1151_v15 = vmul.f32 1.442695, %v1138_v12 }
 0x3b2   :  { %v1153_v18 = vmul.f32 1.442695, %v1139_v14  ;;  %v1132_v20 = vpop.xlane.xlu0 %1131 }
 0x3b3   :  { %4900 = vpow2.f32 %v1151_v15  ;;  %v1140_v21 = vsub.f32 %v1106_v47, %v1132_v20  ;;  %v451_v45 = vpop.permute.xlu1 %450 }
 0x3b4   :  { %4902 = vpow2.f32 %v1153_v18 }
 0x3b5   :  { %v4895_v19 = vpop.eup %4894  ;;  %v1155_v22 = vmul.f32 1.442695, %v1140_v21  ;;  %v160_v21 = vld [vmem:[%s5742_s3 + $0x60] sm:$0xff] }
 0x3b6   :  { %v1163_v27 = vsel %vm516_vm3, %v4895_v19, 0.0  ;;  %v453_v47 = vpop.permute.xlu0 %452 }
 0x3b7   :  { %4904 = vpow2.f32 %v1155_v22  ;;  %1164 = vadd.xlane.f32.xlu1 %v1163_v27  ;;  %v457_v46 = vpop.permute.xlu1 %456  ;;  %v162_v27 = vld [vmem:[%s5742_s3 + $0x70] sm:$0xff] }
 0x3b9   :  { %v4897_v24 = vpop.eup %4896 }
 0x3ba   :  { %v4899_v29 = vpop.eup %4898  ;;  %v1169_v30 = vsel %vm516_vm3, %v4897_v24, 0.0 }
 0x3bb   :  { %1170 = vadd.xlane.f32.xlu1 %v1169_v30  ;;  %v1166_v31 = vsel %vm516_vm3, %v4899_v29, 0.0  ;;  %v459_v49 = vpop.permute.xlu1 %458 }
 0x3bc   :  { %1167 = vadd.xlane.f32.xlu0 %v1166_v31 }
 0x3bd   :  { %v4901_v32 = vpop.eup %4900 }
 0x3be   :  { %v5264_v33 = vpop.eup %4902  ;;  %v1172_v35 = vsel %vm516_vm3, %v4901_v32, 0.0 }
 0x3bf   :  { %v1175_v39 = vsel %vm516_vm3, %v5264_v33, 0.0 }
 0x3c0   :  { %1173 = vadd.xlane.f32.xlu0 %v1172_v35  ;;  %1176 = vadd.xlane.f32.xlu1 %v1175_v39 }
 0x3c1   :  { %v5269_v40 = vpop.eup %4904 }
 0x3c2   :  { %v1178_v44 = vsel %vm516_vm3, %v5269_v40, 0.0 }
 0x3c4   :  { %1179 = vadd.xlane.f32.xlu0 %v1178_v44 }
 0x3d1   :  { %464 = vrot.lane.b32.xlu1 %v5177_v0, %s4974_s29 }
 0x3da   :  { %462 = vrot.lane.b32.xlu0 %v5187_v2, %s4974_s29 }
 0x3e7   :  { %v1162_v48 = vpop.xlane.xlu0 %1161 }
 0x3e8   :  { %4906 = vrcp.f32 %v1162_v48 }
 0x3ec   :  { %v1159_v50 = vpop.xlane.xlu1 %1158 }
 0x3ed   :  { %4908 = vrcp.f32 %v1159_v50 }
 0x3f2   :  { %v4907_v51 = vpop.eup %4906 }
 0x3f3   :  { %v1190_v52 = vmul.f32 %v4907_v51, %v4891_v57 }
 0x3f5   :  { %4524 = vmatmul.mubr.msk.f32.vlgmr.msra.gmra.mrb[16].mxu1 %vm516_vm3, %v1190_v52 }
 0x3f6   :  { %4532 = vmatpush3.msra.mxu1 %v453_v47  ;;  %4533 = vmatprep.mubr.msk.f32.mxu1 %vm4971_vm2, %v4970_v34 }
 0x3f7   :  { %v4909_v0 = vpop.eup %4908  ;;  %4541 = vmatprep.subr.mxu1 %v4970_v34 }
 0x3f8   :  { %v1189_v2 = vmul.f32 %v4909_v0, %v4893_v60 }
 0x3fa   :  { %4519 = vmatmul.mubr.msk.f32.vlgmr.msra.gmra.mrb[8].mxu0 %vm516_vm3, %v1189_v2 }
 0x3fb   :  { %4527 = vmatpush3.msra.mxu0 %v451_v45  ;;  %4528 = vmatprep.mubr.msk.f32.mxu0 %vm4971_vm2, %v4970_v34 }
 0x3fc   :  { %4536 = vmatprep.subr.mxu0 %v4970_v34 }
 0x444   :  { %v1165_v53 = vpop.xlane.xlu1 %1164 }
 0x445   :  { %4910 = vrcp.f32 %v1165_v53 }
 0x448   :  { %v1171_v54 = vpop.xlane.xlu1 %1170 }
 0x449   :  { %4912 = vrcp.f32 %v1171_v54  ;;  %v1168_v55 = vpop.xlane.xlu0 %1167 }
 0x44a   :  { %4914 = vrcp.f32 %v1168_v55 }
 0x44d   :  { %v1174_v56 = vpop.xlane.xlu0 %1173  ;;  %v1177_v57 = vpop.xlane.xlu1 %1176 }
 0x44e   :  { %4916 = vrcp.f32 %v1174_v56 }
 0x44f   :  { %v4911_v59 = vpop.eup %4910  ;;  %4918 = vrcp.f32 %v1177_v57 }
 0x450   :  { %v1191_v60 = vmul.f32 %v4911_v59, %v4895_v19  ;;  %v161_v19 = vld [vmem:[%s5742_s3 + $0x68] sm:$0xff] }
 0x451   :  { %v1180_v61 = vpop.xlane.xlu0 %1179  ;;  %v465_v11 = vpop.permute.xlu1 %464  ;;  %v4791_v22 = vpack.c.bf16 %v161_v19, %v160_v21 }
 0x452   :  { %4920 = vrcp.f32 %v1180_v61  ;;  %4529 = vmatmul.mubr.msk.f32.vlgmr.msra.gmra.mrb[10].mxu0 %vm516_vm3, %v1191_v60  ;;  %v1815_v60 = vsub.s32 3, %v5116_v36 }
 0x453   :  { %v4913_v62 = vpop.eup %4912  ;;  %4537 = vmatpush3.msra.mxu0 %v457_v46  ;;  %4538 = vmatprep.mubr.msk.f32.mxu0 %vm4971_vm2, %v4970_v34 }
 0x454   :  { %v4915_v63 = vpop.eup %4914  ;;  %v1193_v1 = vmul.f32 %v4913_v62, %v4897_v24  ;;  %4546 = vmatprep.subr.mxu0 %v4970_v34  ;;  %v163_v24 = vld [vmem:[%s5742_s3 + $0x78] sm:$0xff]  ;;  %v1816_v61 = vrot.slane %v5122_v38, %v1815_v60 }
 0x455   :  { %v1192_v3 = vmul.f32 %v4915_v63, %v4899_v29  ;;  %v463_v5 = vpop.permute.xlu0 %462  ;;  %v4795_v29 = vpack.c.bf16 %v163_v24, %v162_v27  ;;  %v167_v27 = vld [vmem:[%s5745_s4 + $0x8] sm:$0xff] }
 0x456   :  { %4539 = vmatmul.mubr.msk.f32.vlgmr.msra.gmra.mrb[12].mxu0 %vm516_vm3, %v1193_v1 }
 0x457   :  { %4534 = vmatmul.mubr.msk.f32.vlgmr.msra.gmra.mrb[18].mxu1 %vm516_vm3, %v1192_v3  ;;  %4547 = vmatpush3.msra.mxu0 %v463_v5 }
 0x458   :  { %v4917_v7 = vpop.eup %4916  ;;  %4542 = vmatpush3.msra.mxu1 %v459_v49  ;;  %4543 = vmatprep.mubr.msk.f32.mxu1 %vm4971_vm2, %v4970_v34 }
 0x459   :  { %v4919_v9 = vpop.eup %4918  ;;  %v1194_v6 = vmul.f32 %v4917_v7, %v4901_v32  ;;  %4551 = vmatprep.subr.mxu1 %v4970_v34  ;;  %4548 = vmatprep.mubr.msk.f32.mxu0 %vm4971_vm2, %v4970_v34 }
 0x45a   :  { %v1195_v10 = vmul.f32 %v4919_v9, %v5264_v33  ;;  %4792 = vmatprep.subr.bf16.mxu0 %v4791_v22 }
 0x45b   :  { %4544 = vmatmul.mubr.msk.f32.vlgmr.msra.gmra.mrb[20].mxu1 %vm516_vm3, %v1194_v6 }
 0x45c   :  { %v4921_v12 = vpop.eup %4920  ;;  %4552 = vmatpush3.msra.mxu1 %v465_v11  ;;  %4549 = vmatmul.mubr.msk.f32.vlgmr.msra.gmra.mrb[14].mxu0 %vm516_vm3, %v1195_v10 }
 0x45d   :  { %v1196_v13 = vmul.f32 %v4921_v12, %v5269_v40  ;;  %4553 = vmatprep.mubr.msk.f32.mxu1 %vm4971_vm2, %v4970_v34  ;;  %4794 = vmatpush3.bf16.msra.mxu0 %v4791_v22  ;;  %v166_v22 = vld [vmem:[%s5745_s4] sm:$0xff] }
 0x45e   :  { %4796 = vmatprep.subr.bf16.mxu0 %v4795_v29  ;;  %v4799_v24 = vpack.c.bf16 %v167_v27, %v166_v22 }
 0x45f   :  { %4554 = vmatmul.mubr.msk.f32.vlgmr.msra.gmra.mrb[22].mxu1 %vm516_vm3, %v1196_v13 }
 0x460   :  { %4800 = vmatprep.subr.bf16.mxu1 %v4799_v24 }
 0x461   :  { %4798 = vmatpush3.bf16.msra.mxu0 %v4795_v29  ;;  %4802 = vmatpush3.bf16.msra.mxu1 %v4799_v24  ;;  %v168_v29 = vld [vmem:[%s5745_s4 + $0x10] sm:$0xff] }
 0x4c8   :  { %v1339_v14 = vpop.f32.mrb[16].mxu1 }
 0x4c9   :  { %v4525_v15 = vpop.f32.mrb[17].mxu1 }
 0x4cd   :  { %v1266_v18 = vpop.f32.mrb[8].mxu0 }
 0x4ce   :  { %v4520_v20 = vpop.f32.mrb[9].mxu0 }
 0x525   :  { %v1412_v30 = vpop.f32.mrb[10].mxu0 }
 0x526   :  { %v4530_v31 = vpop.f32.mrb[11].mxu0  ;;  %1783 = vrot.lane.b32.xlu0 %v1412_v30, %s4975_s10  ;;  %v169_v30 = vld [vmem:[%s5745_s4 + $0x18] sm:$0xff] }
 0x527   :  { %v4803_v31 = vpack.c.bf16 %v169_v30, %v168_v29 }
 0x529   :  { %v1558_v32 = vpop.f32.mrb[12].mxu0  ;;  %4804 = vmatprep.subr.bf16.mxu1 %v4803_v31 }
 0x52a   :  { %v1485_v33 = vpop.f32.mrb[18].mxu1  ;;  %v4540_v35 = vpop.f32.mrb[13].mxu0  ;;  %1791 = vrot.lane.b32.xlu0 %v1558_v32, %s4976_s11  ;;  %4806 = vmatpush3.bf16.msra.mxu1 %v4803_v31  ;;  %v170_v32 = vld [vmem:[%s5746_s5] sm:$0xff] }
 0x52b   :  { %1785 = vrot.lane.b32.xlu1 %v1485_v33, %s4975_s10  ;;  %v4535_v39 = vpop.f32.mrb[19].mxu1  ;;  %v171_v33 = vld [vmem:[%s5746_s5 + $0x8] sm:$0xff]  ;;  %v172_v35 = vld [vmem:[%s5746_s5 + $0x10] sm:$0xff] }
 0x52c   :  { %v4807_v39 = vpack.c.bf16 %v171_v33, %v170_v32 }
 0x52e   :  { %v1631_v40 = vpop.f32.mrb[20].mxu1  ;;  %4808 = vmatprep.subr.bf16.mxu0 %v4807_v39 }
 0x52f   :  { %v1704_v44 = vpop.f32.mrb[14].mxu0  ;;  %1793 = vrot.lane.b32.xlu1 %v1631_v40, %s4976_s11  ;;  %v4545_v45 = vpop.f32.mrb[21].mxu1  ;;  %v173_v40 = vld [vmem:[%s5746_s5 + $0x18] sm:$0xff] }
 0x530   :  { %1799 = vrot.lane.b32.xlu0 %v1704_v44, %s4977_s12  ;;  %v4550_v46 = vpop.f32.mrb[15].mxu0  ;;  %v4811_v44 = vpack.c.bf16 %v173_v40, %v172_v35  ;;  %v174_v45 = vld [vmem:[%s5746_s5 + $0x20] sm:$0xff] }
 0x531   :  { %v175_v46 = vld [vmem:[%s5746_s5 + $0x28] sm:$0xff] }
 0x532   :  { %v1777_v47 = vpop.f32.mrb[22].mxu1 }
 0x533   :  { %1801 = vrot.lane.b32.xlu1 %v1777_v47, %s4977_s12  ;;  %v4555_v48 = vpop.f32.mrb[23].mxu1  ;;  %v4815_v47 = vpack.c.bf16 %v175_v46, %v174_v45 }
 0x598   :  { %v1784_v49 = vpop.permute.xlu0 %1783 }
 0x599   :  { %v1805_v52 = vsel %vm516_vm3, %v1266_v18, %v1784_v49 }
 0x59c   :  { %v1792_v50 = vpop.permute.xlu0 %1791 }
 0x59d   :  { %v1786_v51 = vpop.permute.xlu1 %1785  ;;  %v1808_v2 = vsel %vm1807_vm4, %v1805_v52, %v1792_v50 }
 0x59e   :  { %v1806_v55 = vsel %vm516_vm3, %v1339_v14, %v1786_v51 }
 0x5a1   :  { %v1794_v0 = vpop.permute.xlu1 %1793 }
 0x5a2   :  { %v1800_v53 = vpop.permute.xlu0 %1799  ;;  %v1809_v56 = vsel %vm1807_vm4, %v1806_v55, %v1794_v0 }
 0x5a3   :  { %v1811_v54 = vsel %vm1810_vm5, %v1808_v2, %v1800_v53  ;;  %v1929_v2 = vsub.s32 4, %v5116_v36  ;;  %v1935_v53 = vsub.s32 5, %v5116_v36 }
 0x5a4   :  { %4564 = vmatprep.mubr.msk.f32.mxu0 %vm134_vm1, %v1811_v54 }
 0x5a5   :  { %v1802_v57 = vpop.permute.xlu1 %1801  ;;  %v1930_v54 = vrot.slane %v5122_v38, %v1929_v2 }
 0x5a6   :  { %v1812_v59 = vsel %vm1810_vm5, %v1809_v56, %v1802_v57  ;;  %v1936_v57 = vrot.slane %v5122_v38, %v1935_v53 }
 0x5a7   :  { %4565 = vmatmul.mubr.msk.f32.vlgmr.msra.gmra.mrb[16].mxu0 %vm134_vm1, %v1812_v59 }
 0x5a8   :  { %4810 = vmatpush3.bf16.msra.mxu0 %v4807_v39 }
 0x5a9   :  { %4812 = vmatprep.subr.bf16.mxu0 %v4811_v44 }
 0x5ac   :  { %4814 = vmatpush3.bf16.msra.mxu0 %v4811_v44 }
 0x5ad   :  { %4816 = vmatprep.subr.bf16.mxu0 %v4815_v47 }
 0x5b0   :  { %4818 = vmatpush3.bf16.msra.mxu0 %v4815_v47 }
 0x67a   :  { %v4566_v62 = vpop.f32.mrb[16].mxu0 }
 0x67b   :  { %v1895_v63 = vadd.f32 %v4566_v62, %v1816_v61  ;;  %v1889_v1 = vpop.f32.mrb[17].mxu0 }
 0x67c   :  { %v1890_v3 = vadd.f32 %v1889_v1, %v1816_v61 }
 0x67d   :  { %v1899_v5 = vadd.f32 %v5082_v25, %v1895_v63 }
 0x67e   :  { %v1898_v7 = vadd.f32 %v1890_v3, %v5084_v26 }
 0x67f   :  { %v1903_v9 = vsel %vm134_vm1, %v1899_v5, 0.0 }
 0x680   :  { %1904 = vadd.xlane.f32.xlu1 %v1903_v9  ;;  %v1900_v6 = vsel %vm134_vm1, %v1898_v7, 0.0 }
 0x681   :  { %1901 = vadd.xlane.f32.xlu0 %v1900_v6  ;;  %v4193_v6 = vld [vmem:[%s5747_s7] ss:$0 sm:$0xff] }
 0x70d   :  { %v1905_v10 = vpop.xlane.xlu1 %1904 }
 0x70e   :  { %v1908_v11 = vmul.f32 0.03125, %v1905_v10  ;;  %v1902_v12 = vpop.xlane.xlu0 %1901 }
 0x70f   :  { %v1907_v13 = vmul.f32 0.03125, %v1902_v12 }
 0x710   :  { %v1910_v14 = vsub.f32 %v1899_v5, %v1908_v11  ;;  %v176_v5 = vld [vmem:[%s5746_s5 + $0x30] sm:$0xff] }
 0x711   :  { %v1909_v15 = vsub.f32 %v1898_v7, %v1907_v13  ;;  %v177_v7 = vld [vmem:[%s5746_s5 + $0x38] sm:$0xff] }
 0x712   :  { %v1912_v21 = vmul.f32 %v1910_v14, %v1910_v14  ;;  %v4819_v9 = vpack.c.bf16 %v177_v7, %v176_v5 }
 0x713   :  { %v1911_v18 = vmul.f32 %v1909_v15, %v1909_v15 }
 0x714   :  { %v1916_v19 = vsel %vm134_vm1, %v1912_v21, 0.0  ;;  %4820 = vmatprep.subr.bf16.mxu0 %v4819_v9 }
 0x715   :  { %v1913_v20 = vsel %vm134_vm1, %v1911_v18, 0.0  ;;  %4822 = vmatpush3.bf16.msra.mxu0 %v4819_v9  ;;  %v2030_v18 = vsub.s32 6, %v5116_v36 }
 0x716   :  { %1914 = vadd.xlane.f32.xlu0 %v1913_v20 }
 0x717   :  { %v2031_v20 = vrot.slane %v5122_v38, %v2030_v18 }
 0x71a   :  { %1917 = vadd.xlane.f32.xlu0 %v1916_v19 }
 0x7a3   :  { %v1915_v48 = vpop.xlane.xlu0 %1914 }
 0x7a4   :  { %v1919_v49 = vmul.f32 0.03125, %v1915_v48 }
 0x7a6   :  { %v1921_v50 = vadd.f32 1e-05, %v1919_v49  ;;  %v4200_v49 = vld [vmem:[%s5742_s3 + $0x80] sm:$0xff] }
 0x7a7   :  { %v1918_v51 = vpop.xlane.xlu0 %1917 }
 0x7a8   :  { %4922 = vrsqrt.f32 %v1921_v50  ;;  %v1920_v52 = vmul.f32 0.03125, %v1918_v51  ;;  %v4201_v50 = vld [vmem:[%s5742_s3 + $0x88] sm:$0xff] }
 0x7a9   :  { %v4823_v51 = vpack.c.bf16 %v4201_v50, %v4200_v49 }
 0x7aa   :  { %v1922_v0 = vadd.f32 1e-05, %v1920_v52  ;;  %v4208_v52 = vld [vmem:[%s5742_s3 + $0xc0] sm:$0xff] }
 0x7ab   :  { %4824 = vmatprep.subr.bf16.mxu1 %v4823_v51 }
 0x7ac   :  { %4924 = vrsqrt.f32 %v1922_v0  ;;  %v4209_v0 = vld [vmem:[%s5742_s3 + $0xc8] sm:$0xff] }
 0x7b2   :  { %v4923_v55 = vpop.eup %4922 }
 0x7b3   :  { %v1925_v56 = vmul.f32 %v4923_v55, %v1909_v15  ;;  %v4202_v55 = vld [vmem:[%s5742_s3 + $0x90] sm:$0xff] }
 0x7b5   :  { %v1931_v59 = vmul.f32 %v1930_v54, %v1925_v56  ;;  %v4203_v56 = vld [vmem:[%s5742_s3 + $0x98] sm:$0xff] }
 0x7b6   :  { %v4925_v61 = vpop.eup %4924 }
 0x7b7   :  { %v1926_v62 = vmul.f32 %v4925_v61, %v1910_v14  ;;  %v1937_v63 = vadd.f32 %v1936_v57, %v1931_v59  ;;  %v4210_v59 = vld [vmem:[%s5742_s3 + $0xd0] sm:$0xff]  ;;  %v4211_v61 = vld [vmem:[%s5742_s3 + $0xd8] sm:$0xff] }
 0x7b9   :  { %v1932_v1 = vmul.f32 %v1930_v54, %v1926_v62  ;;  %4575 = vmatprep.mubr.msk.f32.mxu1 %vm134_vm1, %v1937_v63  ;;  %v4839_v54 = vpack.c.bf16 %v4209_v0, %v4208_v52  ;;  %v4843_v62 = vpack.c.bf16 %v4211_v61, %v4210_v59 }
 0x7bb   :  { %v1938_v3 = vadd.f32 %v1936_v57, %v1932_v1  ;;  %4840 = vmatprep.subr.bf16.mxu0 %v4839_v54  ;;  %v4827_v57 = vpack.c.bf16 %v4203_v56, %v4202_v55  ;;  %v4205_v1 = vld [vmem:[%s5742_s3 + $0xa8] sm:$0xff] }
 0x7bd   :  { %4576 = vmatmul.mubr.msk.f32.vlgmr.msra.gmra.mrb[24].mxu1 %vm134_vm1, %v1938_v3 }
 0x7be   :  { %4826 = vmatpush3.bf16.msra.mxu1 %v4823_v51 }
 0x7bf   :  { %4828 = vmatprep.subr.bf16.mxu1 %v4827_v57 }
 0x7c2   :  { %4830 = vmatpush3.bf16.msra.mxu1 %v4827_v57 }
 0x890   :  { %v4577_v10 = vpop.f32.mrb[24].mxu1 }
 0x891   :  { %v2023_v11 = vadd.f32 %v4577_v10, %v4193_v6  ;;  %v2017_v12 = vpop.f32.mrb[25].mxu1 }
 0x892   :  { %v2018_v13 = vadd.f32 %v4193_v6, %v2017_v12  ;;  %v2143_v12 = vsub.s32 7, %v5116_v36 }
 0x893   :  { %v2027_v15 = vmax.f32 %v2023_v11, 0.0 }
 0x894   :  { %v2026_v14 = vmax.f32 %v2018_v13, 0.0  ;;  %v2144_v13 = vrot.slane %v5122_v38, %v2143_v12 }
 0x896   :  { %4594 = vmatprep.mubr.msk.f32.mxu0 %vm39_vm0, %v2026_v14 }
 0x897   :  { %4595 = vmatmul.mubr.msk.f32.vlgmr.msra.gmra.mrb[18].mxu0 %vm39_vm0, %v2027_v15 }
 0x898   :  { %4842 = vmatpush3.bf16.msra.mxu0 %v4839_v54 }
 0x899   :  { %4844 = vmatprep.subr.bf16.mxu0 %v4843_v62 }
 0x89c   :  { %4846 = vmatpush3.bf16.msra.mxu0 %v4843_v62 }
 0x89d   :  { %4640 = vmatprep.subr.mxu0 %v4970_v34 }
 0x96a   :  { %v4596_v21 = vpop.f32.mrb[18].mxu0 }
 0x96b   :  { %v2110_v19 = vadd.f32 %v4596_v21, %v2031_v20  ;;  %v2104_v22 = vpop.f32.mrb[19].mxu0 }
 0x96c   :  { %v2105_v27 = vadd.f32 %v2104_v22, %v2031_v20 }
 0x96d   :  { %v2114_v24 = vadd.f32 %v2110_v19, %v1938_v3  ;;  %v4198_v19 = vld [vmem:[%s5743_s6 + $0x8] ss:$0 sm:$0xff] }
 0x96e   :  { %v2113_v29 = vadd.f32 %v2105_v27, %v1937_v63  ;;  %v4204_v63 = vld [vmem:[%s5742_s3 + $0xa0] sm:$0xff] }
 0x96f   :  { %v2118_v30 = vsel %vm134_vm1, %v2114_v24, 0.0  ;;  %v4831_v3 = vpack.c.bf16 %v4205_v1, %v4204_v63 }
 0x970   :  { %2119 = vadd.xlane.f32.xlu0 %v2118_v30  ;;  %v2115_v31 = vsel %vm134_vm1, %v2113_v29, 0.0 }
 0x971   :  { %2116 = vadd.xlane.f32.xlu1 %v2115_v31  ;;  %4832 = vmatprep.subr.bf16.mxu1 %v4831_v3 }
 0x9fd   :  { %v2120_v32 = vpop.xlane.xlu0 %2119 }
 0x9fe   :  { %v2122_v33 = vmul.f32 0.03125, %v2120_v32  ;;  %v2117_v35 = vpop.xlane.xlu1 %2116  ;;  %v5466_v32 = vld [vmem:[%s5743_s6 + $0x10] sm:$0xff] }
 0x9ff   :  { %v2121_v39 = vmul.f32 0.03125, %v2117_v35  ;;  %v2372_v61 = vrot.slane %v5466_v32, %v343_v58 }
 0xa00   :  { %v2124_v40 = vsub.f32 %v2114_v24, %v2122_v33  ;;  %v4206_v24 = vld [vmem:[%s5742_s3 + $0xb0] sm:$0xff]  ;;  %v2210_v33 = vrot.slane %v5466_v32, %v181_v37 }
 0xa01   :  { %v2123_v44 = vsub.f32 %v2113_v29, %v2121_v39  ;;  %v4207_v29 = vld [vmem:[%s5742_s3 + $0xb8] sm:$0xff] }
 0xa02   :  { %v2126_v45 = vmul.f32 %v2124_v40, %v2124_v40  ;;  %v4835_v31 = vpack.c.bf16 %v4207_v29, %v4206_v24 }
 0xa03   :  { %v2125_v46 = vmul.f32 %v2123_v44, %v2123_v44 }
 0xa04   :  { %v2130_v47 = vsel %vm134_vm1, %v2126_v45, 0.0 }
 0xa05   :  { %2131 = vadd.xlane.f32.xlu0 %v2130_v47  ;;  %v2127_v48 = vsel %vm134_vm1, %v2125_v46, 0.0  ;;  %v2293_v47 = vrot.slane %v5466_v32, %v264_v43 }
 0xa06   :  { %2128 = vadd.xlane.f32.xlu1 %v2127_v48 }
 0xa92   :  { %v2132_v5 = vpop.xlane.xlu0 %2131 }
 0xa93   :  { %v2134_v7 = vmul.f32 0.03125, %v2132_v5  ;;  %v2129_v9 = vpop.xlane.xlu1 %2128 }
 0xa94   :  { %v2133_v6 = vmul.f32 0.03125, %v2129_v9 }
 0xa95   :  { %v2136_v10 = vadd.f32 1e-05, %v2134_v7 }
 0xa96   :  { %v2135_v11 = vadd.f32 1e-05, %v2133_v6 }
 0xa97   :  { %4926 = vrsqrt.f32 %v2136_v10 }
 0xa98   :  { %4928 = vrsqrt.f32 %v2135_v11 }
 0xaa1   :  { %v4927_v14 = vpop.eup %4926 }
 0xaa2   :  { %v4929_v15 = vpop.eup %4928  ;;  %v2140_v20 = vmul.f32 %v4927_v14, %v2124_v40 }
 0xaa3   :  { %v2139_v21 = vmul.f32 %v4929_v15, %v2123_v44 }
 0xaa4   :  { %v2146_v22 = vmul.f32 %v2144_v13, %v2140_v20 }
 0xaa5   :  { %v2145_v27 = vmul.f32 %v2144_v13, %v2139_v21 }
 0xaa6   :  { %v5444_v38 = vadd.f32 %v4198_v19, %v2146_v22 }
 0xaa7   :  { %v5442_v30 = vadd.f32 %v4198_v19, %v2145_v27 }
 0xaa8   :  { %v2156_v36 = vcombine.high %v5444_v38, %v5444_v38 }
 0xaa9   :  { %4605 = vmatprep.mubr.msk.f32.mxu1 %vm134_vm1, %v5442_v30  ;;  %4627 = vmatprep.mubr.msk.f32.mxu0 %vm134_vm1, %v5442_v30 }
 0xaaa   :  { %4606 = vmatmul.mubr.msk.f32.vlgmr.msra.gmra.mrb[26].mxu1 %vm134_vm1, %v5444_v38  ;;  %4628 = vmatmul.mubr.msk.f32.vlgmr.msra.gmra.mrb[20].mxu0 %vm134_vm1, %v5444_v38 }
 0xaab   :  { %4834 = vmatpush3.bf16.msra.mxu1 %v4831_v3  ;;  %4616 = vmatprep.mubr.msk.f32.mxu1 %vm134_vm1, %v5442_v30 }
 0xaac   :  { %4836 = vmatprep.subr.bf16.mxu1 %v4835_v31  ;;  %4642 = vmatprep.mubr.msk.f32.mxu0 %vm4971_vm2, %v4970_v34 }
 0xaaf   :  { %4838 = vmatpush3.bf16.msra.mxu1 %v4835_v31 }
 0xab0   :  { %4630 = vmatprep.subr.mxu1 %v4970_v34 }
 0xab2   :  { %4617 = vmatmul.mubr.msk.f32.vlgmr.msra.gmra.mrb[28].mxu1 %vm134_vm1, %v5444_v38 }
 0xab3   :  { %4632 = vmatprep.mubr.msk.f32.mxu1 %vm4971_vm2, %v4970_v34 }
 0xb7d   :  { %v4607_v35 = vpop.f32.mrb[26].mxu1  ;;  %v5471_v39 = vpop.f32.mrb[20].mxu0 }
 0xb7e   :  { %v2287_v40 = vadd.f32 %v4607_v35, %v2210_v33  ;;  %v2281_v44 = vpop.f32.mrb[27].mxu1  ;;  %v2439_v45 = vpop.f32.mrb[21].mxu0  ;;  %v5528_v58 = vadd.f32 %v5471_v39, %v2372_v61 }
 0xb7f   :  { %v2282_v46 = vadd.f32 %v2281_v44, %v2210_v33  ;;  %v5524_v63 = vadd.f32 %v2439_v45, %v2372_v61 }
 0xb80   :  { %2452 = vrot.lane.b32.xlu1 %v2287_v40, %s4972_s27 }
 0xb81   :  { %2454 = vrot.lane.b32.xlu0 %v2282_v46, %s4973_s28 }
 0xb84   :  { %2450 = vrot.lane.b32.xlu1 %v2282_v46, %s4972_s27 }
 0xb85   :  { %v4618_v48 = vpop.f32.mrb[28].mxu1 }
 0xb86   :  { %v2366_v49 = vadd.f32 %v4618_v48, %v2293_v47  ;;  %v2360_v37 = vpop.f32.mrb[29].mxu1 }
 0xb87   :  { %v2361_v50 = vadd.f32 %v2360_v37, %v2293_v47 }
 0xb88   :  { %2466 = vrot.lane.b32.xlu0 %v2366_v49, %s4972_s27  ;;  %2470 = vrot.lane.b32.xlu1 %v2366_v49, %s4973_s28 }
 0xb89   :  { %4631 = vmatpush3.xpose.msk.msra.mxu1 %vm516_vm3, %v2361_v50 }
 0xb8a   :  { %4635 = vmatprep.subr.mxu1 %v4970_v34 }
 0xb8c   :  { %2468 = vrot.lane.b32.xlu0 %v2361_v50, %s4973_s28  ;;  %4633 = vmatmul.mubr.msk.f32.vlgmr.msra.gmra.mrb[30].mxu1 %vm516_vm3, %v2282_v46 }
 0xb8d   :  { %2464 = vrot.lane.b32.xlu1 %v2361_v50, %s4972_s27  ;;  %4636 = vmatpush3.xpose.msk.msra.mxu1 %vm516_vm3, %v2366_v49 }
 0xb8e   :  { %4637 = vmatprep.mubr.msk.f32.mxu1 %vm4971_vm2, %v4970_v34  ;;  %4645 = vmatprep.subr.mxu1 %v4970_v34 }
 0xb90   :  { %2472 = vrot.lane.b32.xlu0 %v2361_v50, %s4974_s29  ;;  %4638 = vmatmul.mubr.msk.f32.vlgmr.msra.gmra.mrb[32].mxu1 %vm516_vm3, %v2287_v40 }
 0xb91   :  { %2456 = vrot.lane.b32.xlu1 %v2287_v40, %s4973_s28  ;;  %4647 = vmatprep.mubr.msk.f32.mxu1 %vm4971_vm2, %v4970_v34 }
 0xb94   :  { %2458 = vrot.lane.b32.xlu0 %v2282_v46, %s4974_s29 }
 0xb95   :  { %2474 = vrot.lane.b32.xlu1 %v2366_v49, %s4974_s29 }
 0xb99   :  { %2460 = vrot.lane.b32.xlu1 %v2287_v40, %s4974_s29 }
 0xbf2   :  { %v2453_v43 = vpop.permute.xlu1 %2452 }
 0xbf3   :  { %v2455_v51 = vpop.permute.xlu0 %2454 }
 0xbf6   :  { %v2451_v52 = vpop.permute.xlu1 %2450 }
 0xbfa   :  { %v2467_v0 = vpop.permute.xlu0 %2466  ;;  %v2471_v54 = vpop.permute.xlu1 %2470 }
 0xbfb   :  { %4646 = vmatpush3.xpose.msk.msra.mxu1 %vm516_vm3, %v2467_v0 }
 0xbfc   :  { %4655 = vmatprep.subr.mxu1 %v4970_v34 }
 0xbfe   :  { %v2469_v55 = vpop.permute.xlu0 %2468  ;;  %4648 = vmatmul.mubr.msk.f32.vlgmr.msra.gmra.mrb[34].mxu1 %vm516_vm3, %v2453_v43 }
 0xbff   :  { %v2465_v56 = vpop.permute.xlu1 %2464  ;;  %4656 = vmatpush3.xpose.msk.msra.mxu1 %vm516_vm3, %v2471_v54  ;;  %4657 = vmatprep.mubr.msk.f32.mxu1 %vm4971_vm2, %v4970_v34 }
 0xc00   :  { %4641 = vmatpush3.xpose.msk.msra.mxu0 %vm516_vm3, %v2465_v56  ;;  %4665 = vmatprep.subr.mxu1 %v4970_v34 }
 0xc01   :  { %4650 = vmatprep.subr.mxu0 %v4970_v34 }
 0xc02   :  { %v2473_v59 = vpop.permute.xlu0 %2472 }
 0xc03   :  { %4643 = vmatmul.mubr.msk.f32.vlgmr.msra.gmra.mrb[22].mxu0 %vm516_vm3, %v2451_v52  ;;  %v2457_v57 = vpop.permute.xlu1 %2456 }
 0xc04   :  { %4651 = vmatpush3.xpose.msk.msra.mxu0 %vm516_vm3, %v2469_v55  ;;  %4658 = vmatmul.mubr.msk.f32.vlgmr.msra.gmra.mrb[36].mxu1 %vm516_vm3, %v2457_v57 }
 0xc05   :  { %4652 = vmatprep.mubr.msk.f32.mxu0 %vm4971_vm2, %v4970_v34  ;;  %4660 = vmatprep.subr.mxu0 %v4970_v34 }
 0xc06   :  { %4667 = vmatprep.mubr.msk.f32.mxu1 %vm4971_vm2, %v4970_v34  ;;  %v2459_v1 = vpop.permute.xlu0 %2458 }
 0xc07   :  { %4653 = vmatmul.mubr.msk.f32.vlgmr.msra.gmra.mrb[24].mxu0 %vm516_vm3, %v2455_v51  ;;  %v2475_v62 = vpop.permute.xlu1 %2474 }
 0xc08   :  { %4661 = vmatpush3.xpose.msk.msra.mxu0 %vm516_vm3, %v2473_v59  ;;  %4666 = vmatpush3.xpose.msk.msra.mxu1 %vm516_vm3, %v2475_v62 }
 0xc09   :  { %4662 = vmatprep.mubr.msk.f32.mxu0 %vm4971_vm2, %v4970_v34  ;;  %4670 = vmatprep.subr.mxu0 %v4970_v34 }
 0xc0a   :  { %4675 = vmatprep.subr.mxu1 %v4970_v34 }
 0xc0b   :  { %4663 = vmatmul.mubr.msk.f32.vlgmr.msra.gmra.mrb[26].mxu0 %vm516_vm3, %v2459_v1  ;;  %v2461_v3 = vpop.permute.xlu1 %2460 }
 0xc0c   :  { %4668 = vmatmul.mubr.msk.f32.vlgmr.msra.gmra.mrb[38].mxu1 %vm516_vm3, %v2461_v3  ;;  %4671 = vmatpush3.msra.mxu0 %v5524_v63 }
 0xc0d   :  { %4676 = vmatpush3.msra.mxu1 %v5528_v58  ;;  %4677 = vmatprep.mubr.msk.f32.mxu1 %vm4971_vm2, %v4970_v34 }
 0xc0e   :  { %4685 = vmatprep.subr.mxu1 %v4970_v34  ;;  %4672 = vmatprep.mubr.msk.f32.mxu0 %vm4971_vm2, %v4970_v34 }
 0xc0f   :  { %4680 = vmatprep.subr.mxu0 %v4970_v34 }
 0xc5f   :  { %v2566_v5 = vpop.f32.mrb[30].mxu1 }
 0xc60   :  { %v2567_v7 = vadd.f32 %v5198_v4, %v2566_v5  ;;  %v4634_v9 = vpop.f32.mrb[31].mxu1 }
 0xc62   :  { %v3088_v6 = vsel %vm516_vm3, %v2567_v7, -inf }
 0xc63   :  { %3089 = vmax.xlane.f32.xlu0 %v3088_v6  ;;  %v2640_v10 = vpop.f32.mrb[32].mxu1 }
 0xc64   :  { %v2641_v11 = vadd.f32 %v5204_v8, %v2640_v10  ;;  %v4639_v13 = vpop.f32.mrb[33].mxu1 }
 0xc66   :  { %v3091_v14 = vsel %vm516_vm3, %v2641_v11, -inf }
 0xc67   :  { %3092 = vmax.xlane.f32.xlu1 %v3091_v14 }
 0xcd1   :  { %v2788_v15 = vpop.f32.mrb[34].mxu1 }
 0xcd2   :  { %v4649_v20 = vpop.f32.mrb[35].mxu1  ;;  %v2789_v4 = vadd.f32 %v5217_v17, %v2788_v15 }
 0xcd4   :  { %v3097_v40 = vsel %vm516_vm3, %v2789_v4, -inf }
 0xcd6   :  { %v2714_v21 = vpop.f32.mrb[22].mxu0 }
 0xcd7   :  { %v2715_v19 = vadd.f32 %v5212_v16, %v2714_v21  ;;  %v4644_v22 = vpop.f32.mrb[23].mxu0  ;;  %v2936_v27 = vpop.f32.mrb[36].mxu1 }
 0xcd8   :  { %v4659_v24 = vpop.f32.mrb[37].mxu1  ;;  %v2937_v35 = vadd.f32 %v5230_v28, %v2936_v27 }
 0xcd9   :  { %v3094_v29 = vsel %vm516_vm3, %v2715_v19, -inf }
 0xcda   :  { %v2862_v31 = vpop.f32.mrb[24].mxu0  ;;  %3095 = vmax.xlane.f32.xlu0 %v3094_v29 }
 0xcdb   :  { %v2863_v8 = vadd.f32 %v5223_v23, %v2862_v31  ;;  %v4654_v33 = vpop.f32.mrb[25].mxu0  ;;  %v3103_v23 = vsel %vm516_vm3, %v2937_v35, -inf }
 0xcdd   :  { %v3100_v39 = vsel %vm516_vm3, %v2863_v8, -inf }
 0xcde   :  { %v3010_v44 = vpop.f32.mrb[26].mxu0  ;;  %3101 = vmax.xlane.f32.xlu1 %v3100_v39  ;;  %3098 = vmax.xlane.f32.xlu0 %v3097_v40 }
 0xcdf   :  { %v3011_v16 = vadd.f32 %v5239_v41, %v3010_v44  ;;  %v4664_v45 = vpop.f32.mrb[27].mxu0  ;;  %v3084_v17 = vpop.f32.mrb[38].mxu1 }
 0xce0   :  { %v4669_v46 = vpop.f32.mrb[39].mxu1  ;;  %v3085_v47 = vadd.f32 %v5244_v42, %v3084_v17 }
 0xce1   :  { %v3106_v48 = vsel %vm516_vm3, %v3011_v16, -inf }
 0xce2   :  { %3107 = vmax.xlane.f32.xlu1 %v3106_v48  ;;  %3104 = vmax.xlane.f32.xlu0 %v3103_v23  ;;  %v3109_v28 = vsel %vm516_vm3, %v3085_v47, -inf }
 0xce6   :  { %3110 = vmax.xlane.f32.xlu0 %v3109_v28 }
 0xcf0   :  { %v3090_v49 = vpop.xlane.xlu0 %3089 }
 0xcf1   :  { %v3112_v37 = vsub.f32 %v2567_v7, %v3090_v49 }
 0xcf3   :  { %2478 = vrot.lane.b32.xlu1 %v5524_v63, %s4972_s27  ;;  %v3120_v43 = vmul.f32 1.442695, %v3112_v37 }
 0xcf4   :  { %v3093_v41 = vpop.xlane.xlu1 %3092 }
 0xcf5   :  { %v3113_v42 = vsub.f32 %v2641_v11, %v3093_v41 }
 0xcf7   :  { %2484 = vrot.lane.b32.xlu1 %v5524_v63, %s4973_s28  ;;  %v3122_v50 = vmul.f32 1.442695, %v3113_v42 }
 0xcf9   :  { %4930 = vpow2.f32 %v3122_v50 }
 0xcfa   :  { %4932 = vpow2.f32 %v3120_v43 }
 0xcfb   :  { %2486 = vrot.lane.b32.xlu1 %v5528_v58, %s4973_s28 }
 0xcfc   :  { %2480 = vrot.lane.b32.xlu0 %v5528_v58, %s4972_s27 }
 0xd03   :  { %v4931_v51 = vpop.eup %4930 }
 0xd04   :  { %v3139_v52 = vsel %vm516_vm3, %v4931_v51, 0.0  ;;  %v4933_v0 = vpop.eup %4932 }
 0xd05   :  { %v3136_v54 = vsel %vm516_vm3, %v4933_v0, 0.0 }
 0xd1b   :  { %3140 = vadd.xlane.f32.xlu0 %v3139_v52 }
 0xd1f   :  { %3137 = vadd.xlane.f32.xlu1 %v3136_v54 }
 0xd67   :  { %v3096_v55 = vpop.xlane.xlu0 %3095 }
 0xd68   :  { %v3114_v56 = vsub.f32 %v2715_v19, %v3096_v55 }
 0xd6a   :  { %v3124_v57 = vmul.f32 1.442695, %v3114_v56 }
 0xd6b   :  { %v3102_v59 = vpop.xlane.xlu1 %3101  ;;  %v3099_v61 = vpop.xlane.xlu0 %3098 }
 0xd6c   :  { %4934 = vpow2.f32 %v3124_v57  ;;  %v3116_v62 = vsub.f32 %v2863_v8, %v3102_v59  ;;  %v3115_v1 = vsub.f32 %v2789_v4, %v3099_v61 }
 0xd6e   :  { %v3128_v3 = vmul.f32 1.442695, %v3116_v62  ;;  %v3126_v5 = vmul.f32 1.442695, %v3115_v1 }
 0xd6f   :  { %v3108_v7 = vpop.xlane.xlu1 %3107  ;;  %v3105_v9 = vpop.xlane.xlu0 %3104 }
 0xd70   :  { %4936 = vpow2.f32 %v3128_v3  ;;  %v3118_v6 = vsub.f32 %v3011_v16, %v3108_v7  ;;  %v3117_v10 = vsub.f32 %v2937_v35, %v3105_v9 }
 0xd71   :  { %4938 = vpow2.f32 %v3126_v5 }
 0xd72   :  { %v3132_v11 = vmul.f32 1.442695, %v3118_v6  ;;  %v3130_v13 = vmul.f32 1.442695, %v3117_v10  ;;  %v4212_v10 = vld [vmem:[%s5742_s3 + $0xe0] sm:$0xff] }
 0xd73   :  { %v3111_v14 = vpop.xlane.xlu0 %3110  ;;  %v2479_v40 = vpop.permute.xlu1 %2478 }
 0xd74   :  { %4940 = vpow2.f32 %v3132_v11  ;;  %v3119_v15 = vsub.f32 %v3085_v47, %v3111_v14  ;;  %v4213_v11 = vld [vmem:[%s5742_s3 + $0xe8] sm:$0xff]  ;;  %v4215_v14 = vld [vmem:[%s5742_s3 + $0xf8] sm:$0xff] }
 0xd75   :  { %4942 = vpow2.f32 %v3130_v13  ;;  %v4847_v13 = vpack.c.bf16 %v4213_v11, %v4212_v10  ;;  %v4222_v11 = vld [vmem:[%s5746_s5 + $0x40] sm:$0xff] }
 0xd76   :  { %v4935_v20 = vpop.eup %4934  ;;  %v3134_v21 = vmul.f32 1.442695, %v3119_v15 }
 0xd77   :  { %v3142_v19 = vsel %vm516_vm3, %v4935_v20, 0.0  ;;  %v2485_v44 = vpop.permute.xlu1 %2484  ;;  %v2481_v16 = vpop.permute.xlu0 %2480 }
 0xd78   :  { %4944 = vpow2.f32 %v3134_v21  ;;  %3143 = vadd.xlane.f32.xlu1 %v3142_v19 }
 0xd7a   :  { %v4937_v22 = vpop.eup %4936 }
 0xd7b   :  { %v4939_v27 = vpop.eup %4938  ;;  %v3148_v24 = vsel %vm516_vm3, %v4937_v22, 0.0  ;;  %v2487_v45 = vpop.permute.xlu1 %2486 }
 0xd7c   :  { %3149 = vadd.xlane.f32.xlu1 %v3148_v24  ;;  %v3145_v4 = vsel %vm516_vm3, %v4939_v27, 0.0 }
 0xd7d   :  { %3146 = vadd.xlane.f32.xlu0 %v3145_v4 }
 0xd7e   :  { %v4941_v29 = vpop.eup %4940 }
 0xd7f   :  { %v4943_v31 = vpop.eup %4942  ;;  %v3154_v8 = vsel %vm516_vm3, %v4941_v29, 0.0 }
 0xd80   :  { %3155 = vadd.xlane.f32.xlu1 %v3154_v8  ;;  %v3151_v33 = vsel %vm516_vm3, %v4943_v31, 0.0 }
 0xd81   :  { %3152 = vadd.xlane.f32.xlu0 %v3151_v33 }
 0xd82   :  { %v5571_v35 = vpop.eup %4944 }
 0xd83   :  { %v3157_v39 = vsel %vm516_vm3, %v5571_v35, 0.0 }
 0xd85   :  { %3158 = vadd.xlane.f32.xlu0 %v3157_v39 }
 0xd91   :  { %2492 = vrot.lane.b32.xlu1 %v5528_v58, %s4974_s29 }
 0xd9b   :  { %2490 = vrot.lane.b32.xlu0 %v5524_v63, %s4974_s29 }
 0xda8   :  { %v3141_v17 = vpop.xlane.xlu0 %3140 }
 0xda9   :  { %4946 = vrcp.f32 %v3141_v17 }
 0xdac   :  { %v3138_v46 = vpop.xlane.xlu1 %3137 }
 0xdad   :  { %4948 = vrcp.f32 %v3138_v46 }
 0xdb3   :  { %v4947_v47 = vpop.eup %4946 }
 0xdb4   :  { %v3169_v48 = vmul.f32 %v4947_v47, %v4931_v51 }
 0xdb6   :  { %4678 = vmatmul.mubr.msk.f32.vlgmr.msra.gmra.mrb[40].mxu1 %vm516_vm3, %v3169_v48 }
 0xdb7   :  { %v4949_v23 = vpop.eup %4948  ;;  %4686 = vmatpush3.msra.mxu1 %v2481_v16  ;;  %4687 = vmatprep.mubr.msk.f32.mxu1 %vm4971_vm2, %v4970_v34 }
 0xdb8   :  { %v3168_v58 = vmul.f32 %v4949_v23, %v4933_v0  ;;  %4695 = vmatprep.subr.mxu1 %v4970_v34 }
 0xdba   :  { %4673 = vmatmul.mubr.msk.f32.vlgmr.msra.gmra.mrb[28].mxu0 %vm516_vm3, %v3168_v58 }
 0xdbb   :  { %4681 = vmatpush3.msra.mxu0 %v2479_v40  ;;  %4682 = vmatprep.mubr.msk.f32.mxu0 %vm4971_vm2, %v4970_v34 }
 0xdbc   :  { %4690 = vmatprep.subr.mxu0 %v4970_v34 }
 0xe05   :  { %v3144_v63 = vpop.xlane.xlu1 %3143 }
 0xe06   :  { %4950 = vrcp.f32 %v3144_v63 }
 0xe09   :  { %v3150_v28 = vpop.xlane.xlu1 %3149 }
 0xe0a   :  { %4952 = vrcp.f32 %v3150_v28  ;;  %v3147_v41 = vpop.xlane.xlu0 %3146  ;;  %v3793_v28 = vrot.slane %v5466_v32, %v1815_v60 }
 0xe0b   :  { %4954 = vrcp.f32 %v3147_v41 }
 0xe0d   :  { %v3156_v42 = vpop.xlane.xlu1 %3155 }
 0xe0e   :  { %4956 = vrcp.f32 %v3156_v42  ;;  %v3153_v49 = vpop.xlane.xlu0 %3152 }
 0xe0f   :  { %4958 = vrcp.f32 %v3153_v49 }
 0xe10   :  { %v4951_v37 = vpop.eup %4950 }
 0xe11   :  { %v3170_v50 = vmul.f32 %v4951_v37, %v4935_v20  ;;  %v2493_v62 = vpop.permute.xlu1 %2492 }
 0xe12   :  { %v3159_v43 = vpop.xlane.xlu0 %3158 }
 0xe13   :  { %4960 = vrcp.f32 %v3159_v43  ;;  %4683 = vmatmul.mubr.msk.f32.vlgmr.msra.gmra.mrb[30].mxu0 %vm516_vm3, %v3170_v50 }
 0xe14   :  { %v4953_v51 = vpop.eup %4952  ;;  %4691 = vmatpush3.msra.mxu0 %v2485_v44  ;;  %4692 = vmatprep.mubr.msk.f32.mxu0 %vm4971_vm2, %v4970_v34 }
 0xe15   :  { %v4955_v52 = vpop.eup %4954  ;;  %v3172_v0 = vmul.f32 %v4953_v51, %v4937_v22  ;;  %4700 = vmatprep.subr.mxu0 %v4970_v34 }
 0xe16   :  { %v3171_v54 = vmul.f32 %v4955_v52, %v4939_v27  ;;  %v2491_v55 = vpop.permute.xlu0 %2490 }
 0xe17   :  { %4693 = vmatmul.mubr.msk.f32.vlgmr.msra.gmra.mrb[32].mxu0 %vm516_vm3, %v3172_v0 }
 0xe18   :  { %v4957_v56 = vpop.eup %4956  ;;  %4688 = vmatmul.mubr.msk.f32.vlgmr.msra.gmra.mrb[42].mxu1 %vm516_vm3, %v3171_v54  ;;  %4701 = vmatpush3.msra.mxu0 %v2491_v55 }
 0xe19   :  { %v4959_v57 = vpop.eup %4958  ;;  %v3174_v59 = vmul.f32 %v4957_v56, %v4941_v29  ;;  %4696 = vmatpush3.msra.mxu1 %v2487_v45  ;;  %4697 = vmatprep.mubr.msk.f32.mxu1 %vm4971_vm2, %v4970_v34 }
 0xe1a   :  { %v3173_v61 = vmul.f32 %v4959_v57, %v4943_v31  ;;  %4702 = vmatprep.mubr.msk.f32.mxu0 %vm4971_vm2, %v4970_v34  ;;  %4705 = vmatprep.subr.mxu1 %v4970_v34 }
 0xe1b   :  { %4703 = vmatmul.mubr.msk.f32.vlgmr.msra.gmra.mrb[34].mxu0 %vm516_vm3, %v3174_v59  ;;  %4848 = vmatprep.subr.bf16.mxu0 %v4847_v13 }
 0xe1c   :  { %4698 = vmatmul.mubr.msk.f32.vlgmr.msra.gmra.mrb[44].mxu1 %vm516_vm3, %v3173_v61  ;;  %4850 = vmatpush3.bf16.msra.mxu0 %v4847_v13  ;;  %v4223_v13 = vld [vmem:[%s5746_s5 + $0x48] sm:$0xff] }
 0xe1d   :  { %v4961_v1 = vpop.eup %4960  ;;  %4706 = vmatpush3.msra.mxu1 %v2493_v62  ;;  %4707 = vmatprep.mubr.msk.f32.mxu1 %vm4971_vm2, %v4970_v34  ;;  %v4214_v34 = vld [vmem:[%s5742_s3 + $0xf0] sm:$0xff] }
 0xe1e   :  { %v3175_v3 = vmul.f32 %v4961_v1, %v5571_v35  ;;  %v4851_v15 = vpack.c.bf16 %v4215_v14, %v4214_v34  ;;  %v4224_v34 = vld [vmem:[%s5746_s5 + $0x50] sm:$0xff]  ;;  %v4863_v14 = vpack.c.bf16 %v4223_v13, %v4222_v11 }
 0xe20   :  { %4708 = vmatmul.mubr.msk.f32.vlgmr.msra.gmra.mrb[46].mxu1 %vm516_vm3, %v3175_v3  ;;  %4852 = vmatprep.subr.bf16.mxu0 %v4851_v15  ;;  %v4218_v3 = vld [vmem:[%s5745_s4 + $0x20] sm:$0xff] }
 0xe21   :  { %4854 = vmatpush3.bf16.msra.mxu0 %v4851_v15  ;;  %v4225_v15 = vld [vmem:[%s5746_s5 + $0x58] sm:$0xff] }
 0xe22   :  { %4864 = vmatprep.subr.bf16.mxu0 %v4863_v14 }
 0xe89   :  { %v3318_v5 = vpop.f32.mrb[40].mxu1 }
 0xe8a   :  { %v4679_v7 = vpop.f32.mrb[41].mxu1 }
 0xe8d   :  { %v3245_v9 = vpop.f32.mrb[28].mxu0 }
 0xe8e   :  { %v4674_v6 = vpop.f32.mrb[29].mxu0 }
 0xe8f   :  { %v4221_v6 = vld [vmem:[%s5745_s4 + $0x38] sm:$0xff] }
 0xee6   :  { %v3391_v20 = vpop.f32.mrb[30].mxu0 }
 0xee7   :  { %v4684_v21 = vpop.f32.mrb[31].mxu0  ;;  %3762 = vrot.lane.b32.xlu0 %v3391_v20, %s4975_s10  ;;  %v4867_v20 = vpack.c.bf16 %v4225_v15, %v4224_v34 }
 0xee8   :  { %v4226_v21 = vld [vmem:[%s5746_s5 + $0x60] sm:$0xff] }
 0xeea   :  { %v3537_v19 = vpop.f32.mrb[32].mxu0 }
 0xeeb   :  { %v3464_v22 = vpop.f32.mrb[42].mxu1  ;;  %v4694_v27 = vpop.f32.mrb[33].mxu0  ;;  %3770 = vrot.lane.b32.xlu0 %v3537_v19, %s4976_s11  ;;  %v4227_v19 = vld [vmem:[%s5746_s5 + $0x68] sm:$0xff] }
 0xeec   :  { %3764 = vrot.lane.b32.xlu1 %v3464_v22, %s4975_s10  ;;  %v4689_v24 = vpop.f32.mrb[43].mxu1  ;;  %v4871_v22 = vpack.c.bf16 %v4227_v19, %v4226_v21 }
 0xeee   :  { %v3683_v4 = vpop.f32.mrb[34].mxu0 }
 0xeef   :  { %v3610_v29 = vpop.f32.mrb[44].mxu1  ;;  %3778 = vrot.lane.b32.xlu0 %v3683_v4, %s4977_s12  ;;  %v4704_v31 = vpop.f32.mrb[35].mxu0 }
 0xef0   :  { %3772 = vrot.lane.b32.xlu1 %v3610_v29, %s4976_s11  ;;  %v4699_v8 = vpop.f32.mrb[45].mxu1 }
 0xef3   :  { %v3756_v33 = vpop.f32.mrb[46].mxu1 }
 0xef4   :  { %3780 = vrot.lane.b32.xlu1 %v3756_v33, %s4977_s12  ;;  %v4709_v35 = vpop.f32.mrb[47].mxu1  ;;  %v3906_v33 = vrot.slane %v5466_v32, %v1929_v2  ;;  %v4228_v2 = vld [vmem:[%s5746_s5 + $0x70] sm:$0xff] }
 0xf59   :  { %v3763_v39 = vpop.permute.xlu0 %3762 }
 0xf5a   :  { %v3784_v16 = vsel %vm516_vm3, %v3245_v9, %v3763_v39  ;;  %v4220_v9 = vld [vmem:[%s5745_s4 + $0x30] sm:$0xff] }
 0xf5b   :  { %v4859_v10 = vpack.c.bf16 %v4221_v6, %v4220_v9  ;;  %v123_v9 = vcombine.high %v5084_v26, %v5084_v26  ;;  %v2155_v6 = vcombine.high %v5442_v30, %v5442_v30 }
 0xf5d   :  { %v3771_v40 = vpop.permute.xlu0 %3770 }
 0xf5e   :  { %v3765_v44 = vpop.permute.xlu1 %3764  ;;  %v3786_v45 = vsel %vm1807_vm4, %v3784_v16, %v3771_v40  ;;  %v3912_v40 = vrot.slane %v5466_v32, %v1935_v53  ;;  %v4263_v53 = vld [vmem:[%s5747_s7 + $0x1] ss:$0 sm:$0xff]  ;;  %s4979_s7 = smov 64  }
 0xf5f   :  { %v3785_v48 = vsel %vm516_vm3, %v3318_v5, %v3765_v44  ;;  %v4219_v5 = vld [vmem:[%s5745_s4 + $0x28] sm:$0xff] }
 0xf60   :  { %v4855_v7 = vpack.c.bf16 %v4219_v5, %v4218_v3 }
 0xf61   :  { %v3779_v17 = vpop.permute.xlu0 %3778 }
 0xf62   :  { %v3788_v46 = vsel %vm1810_vm5, %v3786_v45, %v3779_v17  ;;  %v3773_v47 = vpop.permute.xlu1 %3772  ;;  %4856 = vmatprep.subr.bf16.mxu1 %v4855_v7 }
 0xf63   :  { %4718 = vmatprep.mubr.msk.f32.mxu0 %vm134_vm1, %v3788_v46  ;;  %v3787_v23 = vsel %vm1807_vm4, %v3785_v48, %v3773_v47  ;;  %4858 = vmatpush3.bf16.msra.mxu1 %v4855_v7  ;;  %v4229_v48 = vld [vmem:[%s5746_s5 + $0x78] sm:$0xff]  ;;  %s4978_s5 = smov 32  }
 0xf64   :  { %4860 = vmatprep.subr.bf16.mxu1 %v4859_v10 }
 0xf66   :  { %v3781_v58 = vpop.permute.xlu1 %3780 }
 0xf67   :  { %v3789_v63 = vsel %vm1810_vm5, %v3787_v23, %v3781_v58  ;;  %4862 = vmatpush3.bf16.msra.mxu1 %v4859_v10  ;;  %v4875_v23 = vpack.c.bf16 %v4229_v48, %v4228_v2  ;;  %v124_v10 = vcombine.high %v5082_v25, %v5082_v25 }
 0xf68   :  { %4719 = vmatmul.mubr.msk.f32.vlgmr.msra.gmra.mrb[36].mxu0 %vm134_vm1, %v3789_v63 }
 0xf69   :  { %4866 = vmatpush3.bf16.msra.mxu0 %v4863_v14 }
 0xf6a   :  { %4868 = vmatprep.subr.bf16.mxu0 %v4867_v20 }
 0xf6d   :  { %4870 = vmatpush3.bf16.msra.mxu0 %v4867_v20 }
 0xf6e   :  { %4872 = vmatprep.subr.bf16.mxu0 %v4871_v22 }
 0xf71   :  { %4874 = vmatpush3.bf16.msra.mxu0 %v4871_v22 }
 0xf72   :  { %4876 = vmatprep.subr.bf16.mxu0 %v4875_v23 }
 0xf75   :  { %4878 = vmatpush3.bf16.msra.mxu0 %v4875_v23 }
0x103b   :  { %v4720_v41 = vpop.f32.mrb[36].mxu0 }
0x103c   :  { %v3872_v42 = vadd.f32 %v4720_v41, %v3793_v28  ;;  %v3866_v49 = vpop.f32.mrb[37].mxu0 }
0x103d   :  { %v3867_v37 = vadd.f32 %v3866_v49, %v3793_v28 }
0x103e   :  { %v3876_v50 = vadd.f32 %v3872_v42, %v5444_v38 }
0x103f   :  { %v3875_v43 = vadd.f32 %v3867_v37, %v5442_v30  ;;  %v4007_v37 = vrot.slane %v5466_v32, %v2030_v18 }
0x1040   :  { %v3880_v51 = vsel %vm134_vm1, %v3876_v50, 0.0 }
0x1041   :  { %3881 = vadd.xlane.f32.xlu1 %v3880_v51  ;;  %v3877_v52 = vsel %vm134_vm1, %v3875_v43, 0.0 }
0x1042   :  { %3878 = vadd.xlane.f32.xlu0 %v3877_v52 }
0x10ce   :  { %v3882_v0 = vpop.xlane.xlu1 %3881 }
0x10cf   :  { %v3884_v54 = vmul.f32 0.03125, %v3882_v0  ;;  %v3879_v55 = vpop.xlane.xlu0 %3878 }
0x10d0   :  { %v3883_v56 = vmul.f32 0.03125, %v3879_v55 }
0x10d1   :  { %v3886_v57 = vsub.f32 %v3876_v50, %v3884_v54 }
0x10d2   :  { %v3885_v60 = vsub.f32 %v3875_v43, %v3883_v56 }
0x10d3   :  { %v3888_v62 = vmul.f32 %v3886_v57, %v3886_v57 }
0x10d4   :  { %v3887_v59 = vmul.f32 %v3885_v60, %v3885_v60 }
0x10d5   :  { %v3892_v1 = vsel %vm134_vm1, %v3888_v62, 0.0 }
0x10d6   :  { %v3889_v61 = vsel %vm134_vm1, %v3887_v59, 0.0 }
0x10d7   :  { %3890 = vadd.xlane.f32.xlu0 %v3889_v61 }
0x10db   :  { %3893 = vadd.xlane.f32.xlu0 %v3892_v1 }
0x1164   :  { %v3891_v27 = vpop.xlane.xlu0 %3890 }
0x1165   :  { %v3895_v24 = vmul.f32 0.03125, %v3891_v27 }
0x1167   :  { %v3897_v4 = vadd.f32 1e-05, %v3895_v24 }
0x1168   :  { %v3894_v29 = vpop.xlane.xlu0 %3893 }
0x1169   :  { %4962 = vrsqrt.f32 %v3897_v4  ;;  %v3896_v31 = vmul.f32 0.03125, %v3894_v29 }
0x116b   :  { %v3898_v8 = vadd.f32 1e-05, %v3896_v31 }
0x116d   :  { %4964 = vrsqrt.f32 %v3898_v8 }
0x1173   :  { %v4963_v35 = vpop.eup %4962 }
0x1174   :  { %v3901_v39 = vmul.f32 %v4963_v35, %v3885_v60 }
0x1176   :  { %v3907_v44 = vmul.f32 %v3906_v33, %v3901_v39 }
0x1177   :  { %v4965_v16 = vpop.eup %4964 }
0x1178   :  { %v3902_v45 = vmul.f32 %v4965_v16, %v3886_v57  ;;  %v3913_v17 = vadd.f32 %v3912_v40, %v3907_v44 }
0x117a   :  { %v3908_v46 = vmul.f32 %v3906_v33, %v3902_v45  ;;  %4729 = vmatprep.mubr.msk.f32.mxu1 %vm134_vm1, %v3913_v17 }
0x117c   :  { %v3914_v47 = vadd.f32 %v3912_v40, %v3908_v46 }
0x117e   :  { %4730 = vmatmul.mubr.msk.f32.vlgmr.msra.gmra.mrb[48].mxu1 %vm134_vm1, %v3914_v47 }
0x1251   :  { %v4731_v58 = vpop.f32.mrb[48].mxu1 }
0x1252   :  { %v3999_v63 = vadd.f32 %v4731_v58, %v4263_v53  ;;  %v3993_v28 = vpop.f32.mrb[49].mxu1 }
0x1253   :  { %v3994_v41 = vadd.f32 %v4263_v53, %v3993_v28 }
0x1254   :  { %v4003_v49 = vmax.f32 %v3999_v63, 0.0 }
0x1255   :  { %v4002_v42 = vmax.f32 %v3994_v41, 0.0 }
0x1257   :  { %4748 = vmatprep.mubr.msk.f32.mxu0 %vm39_vm0, %v4002_v42 }
0x1258   :  { %4749 = vmatmul.mubr.msk.f32.vlgmr.msra.gmra.mrb[38].mxu0 %vm39_vm0, %v4003_v49 }
0x132b   :  { %v4750_v50 = vpop.f32.mrb[38].mxu0 }
0x132c   :  { %v4086_v43 = vadd.f32 %v4750_v50, %v4007_v37  ;;  %v4080_v51 = vpop.f32.mrb[39].mxu0 }
0x132d   :  { %v4081_v52 = vadd.f32 %v4080_v51, %v4007_v37 }
0x132e   :  { %v4090_v0 = vadd.f32 %v4086_v43, %v3914_v47 }
0x132f   :  { %v4089_v54 = vadd.f32 %v4081_v52, %v3913_v17 }
0x1330   :  { %v4094_v55 = vsel %vm134_vm1, %v4090_v0, 0.0 }
0x1331   :  { %4095 = vadd.xlane.f32.xlu0 %v4094_v55  ;;  %v4091_v56 = vsel %vm134_vm1, %v4089_v54, 0.0 }
0x1332   :  { %4092 = vadd.xlane.f32.xlu1 %v4091_v56 }
0x13be   :  { %v4096_v57 = vpop.xlane.xlu0 %4095 }
0x13bf   :  { %v4098_v60 = vmul.f32 0.03125, %v4096_v57  ;;  %v4093_v59 = vpop.xlane.xlu1 %4092 }
0x13c0   :  { %v4097_v61 = vmul.f32 0.03125, %v4093_v59 }
0x13c1   :  { %v4100_v62 = vsub.f32 %v4090_v0, %v4098_v60 }
0x13c2   :  { %v4099_v1 = vsub.f32 %v4089_v54, %v4097_v61 }
0x13c3   :  { %v4102_v3 = vmul.f32 %v4100_v62, %v4100_v62 }
0x13c4   :  { %v4101_v18 = vmul.f32 %v4099_v1, %v4099_v1 }
0x13c5   :  { %v4106_v5 = vsel %vm134_vm1, %v4102_v3, 0.0 }
0x13c6   :  { %4107 = vadd.xlane.f32.xlu0 %v4106_v5  ;;  %v4103_v7 = vsel %vm134_vm1, %v4101_v18, 0.0 }
0x13c7   :  { %4104 = vadd.xlane.f32.xlu1 %v4103_v7 }
0x13d8   :  { %125 = vrot.lane.b32.xlu1 %v123_v9, %s4978_s5 }
0x13dc   :  { %2157 = vrot.lane.b32.xlu0 %v2155_v6, %s4978_s5  ;;  %128 = vrot.lane.b32.xlu1 %v5082_v25, %s4979_s7 }
0x13e0   :  { %2160 = vrot.lane.b32.xlu0 %v5444_v38, %s4979_s7 }
0x13e4   :  { %131 = vrot.lane.b32.xlu0 %v124_v10, %s4980_s13 }
0x1453   :  { %v4108_v11 = vpop.xlane.xlu0 %4107 }
0x1454   :  { %v4110_v13 = vmul.f32 0.03125, %v4108_v11  ;;  %v4105_v34 = vpop.xlane.xlu1 %4104 }
0x1455   :  { %v4109_v14 = vmul.f32 0.03125, %v4105_v34 }
0x1456   :  { %v4112_v15 = vadd.f32 1e-05, %v4110_v13 }
0x1457   :  { %v4111_v20 = vadd.f32 1e-05, %v4109_v14  ;;  %v2158_v21 = vpop.permute.xlu0 %2157 }
0x1458   :  { %4966 = vrsqrt.f32 %v4112_v15  ;;  %v126_v19 = vpop.permute.xlu1 %125  ;;  %v2166_v22 = vsel %vm134_vm1, %v5442_v30, %v2158_v21  ;;  %v4120_v30 = vrot.slane %v5466_v32, %v2143_v12 }
0x1459   :  { %4968 = vrsqrt.f32 %v4111_v20  ;;  %v135_v4 = vsel %vm134_vm1, %v5084_v26, %v126_v19  ;;  %v4268_v26 = vld [vmem:[%s5743_s6 + $0x18] ss:$0 sm:$0xff] }
0x145b   :  { %v2161_v27 = vpop.permute.xlu0 %2160 }
0x145c   :  { %v2167_v24 = vsel %vm39_vm0, %v2166_v22, %v2161_v27  ;;  %v129_v25 = vpop.permute.xlu1 %128 }
0x145d   :  { %v136_v29 = vsel %vm39_vm0, %v135_v4, %v129_v25 }
0x145f   :  { %v132_v31 = vpop.permute.xlu0 %131 }
0x1460   :  { %v138_v8 = vsel %vm137_vm6, %v136_v29, %v132_v31 }
0x1461   :  { %139 = vst [vmem:[%s5748_s8] sm:$0xf] %v138_v8 }
0x1462   :  { %v4967_v33 = vpop.eup %4966 }
0x1463   :  { %v4969_v35 = vpop.eup %4968  ;;  %v4116_v39 = vmul.f32 %v4967_v33, %v4100_v62 }
0x1464   :  { %v4115_v40 = vmul.f32 %v4969_v35, %v4099_v1 }
0x1465   :  { %v4122_v44 = vmul.f32 %v4120_v30, %v4116_v39 }
0x1466   :  { %v4121_v16 = vmul.f32 %v4120_v30, %v4115_v40 }
0x1467   :  { %v4128_v45 = vadd.f32 %v4268_v26, %v4122_v44 }
0x1468   :  { %v4127_v17 = vadd.f32 %v4268_v26, %v4121_v16 }
0x1469   :  { %4136 = vrot.lane.b32.xlu1 %v4128_v45, %s4979_s7  ;;  %v4132_v46 = vcombine.high %v4128_v45, %v4128_v45 }
0x146a   :  { %v4131_v47 = vcombine.high %v4127_v17, %v4127_v17 }
0x146b   :  { %4139 = vrot.lane.b32.xlu0 %v4132_v46, %s4980_s13 }
0x146d   :  { %4133 = vrot.lane.b32.xlu1 %v4131_v47, %s4978_s5 }
0x1471   :  { %2163 = vrot.lane.b32.xlu1 %v2156_v36, %s4980_s13 }
0x14db   :  { %v4137_v12 = vpop.permute.xlu1 %4136 }
0x14dd   :  { %v4140_v48 = vpop.permute.xlu0 %4139 }
0x14df   :  { %v4134_v32 = vpop.permute.xlu1 %4133 }
0x14e0   :  { %v4142_v2 = vsel %vm134_vm1, %v4127_v17, %v4134_v32 }
0x14e1   :  { %v4143_v23 = vsel %vm39_vm0, %v4142_v2, %v4137_v12 }
0x14e2   :  { %v4144_v53 = vsel %vm137_vm6, %v4143_v23, %v4140_v48 }
0x14e3   :  { %4269 = vst [vmem:[%s5748_s8 + $0x8] sm:$0xf] %v4144_v53  ;;  %v2164_v58 = vpop.permute.xlu1 %2163 }
0x14e4   :  { %v2168_v63 = vsel %vm137_vm6, %v2167_v24, %v2164_v58 }
0x14e5   :  { %4199 = vst [vmem:[%s5748_s8 + $0x4] sm:$0xf] %v2168_v63 }

</bundles_post_ra>
